<compile_context>
chip_gen: v7x
topology: tpu7x:2x2x1
jax: 0.10.0
libtpu: 0.0.40
codegen_flags: <defaults>
</compile_context>

<pallas_src>
import functools

import numpy as np
import jax
import jax.numpy as jnp
from jax import lax
from jax.experimental import pallas as pl
from jax.experimental.pallas import tpu as pltpu


def mlp_kernel(x_ref, w_ref, o_ref, *, layers_per_block):
    """One grid step == `layers_per_block` layers applied to the resident activation."""
    layer_blk = pl.program_id(1)

    # Initialize the VMEM-resident activation from the input on the first layer block.
    @pl.when(layer_blk == 0)
    def _():
        o_ref[...] = x_ref[...]

    # Carry the activation in bf16: the MXU LHS is bf16 anyway, and a packed
    # bf16 carry avoids per-layer f32<->bf16 relayout work.
    state = o_ref[...].astype(jnp.bfloat16)  # (Bt, N)

    def body(j, s):
        # w_ref is (LB, N, N) bf16, already laid out (in, out): y = s @ W.
        h = jnp.dot(s, w_ref[j], preferred_element_type=jnp.float32)
        return jnp.tanh(h).astype(jnp.bfloat16)

    state = lax.fori_loop(0, layers_per_block, body, state, unroll=True)

    # Constant output block index along the layer axis -> o_ref stays resident
    # in VMEM across layer blocks and is written back to HBM once at the end.
    o_ref[...] = state.astype(jnp.float32)


def prepare_weights(weights):
    """One-time layout plumbing, hoisted out of the hot path.

    (L, out, in) f32 PyTorch layout -> (L, in, out) bf16 streaming layout.
    """
    return jnp.transpose(weights, (0, 2, 1)).astype(jnp.bfloat16)


def choose_layers_per_block(num_layers, n, *, min_steps=4,
                            vmem_budget_bytes=24 * 1024 * 1024):
    """Largest divisor of num_layers keeping >= min_steps grid steps and the
    double-buffered bf16 weight slab within a conservative VMEM budget."""
    max_lb_vmem = max(1, vmem_budget_bytes // (2 * n * n * 2))
    best = 1
    for lb in range(1, num_layers + 1):
        if num_layers % lb == 0 and lb <= max_lb_vmem and num_layers // lb >= min_steps:
            best = lb
    return best


def mlp_forward(x, w_in_out_bf16, *, layers_per_block, batch_blocks=1):
    """x: (B, N) f32, w_in_out_bf16: (L, N, N) bf16 (already (in,out)) -> (B, N) f32."""
    B, N = x.shape
    L = w_in_out_bf16.shape[0]
    assert w_in_out_bf16.shape == (L, N, N)
    assert L % layers_per_block == 0, "layers_per_block must divide L"
    n_layer_blocks = L // layers_per_block
    assert B % batch_blocks == 0
    bt = B // batch_blocks
    if batch_blocks > 1:
        assert bt % 8 == 0, "per-core batch tile must be a multiple of 8 sublanes"

    kernel = functools.partial(mlp_kernel, layers_per_block=layers_per_block)

    cost = pl.CostEstimate(
        flops=2 * L * B * N * N,
        transcendentals=L * B * N,
        bytes_accessed=batch_blocks * L * N * N * 2 + 2 * B * N * 4,
    )

    # Double-buffered bf16 weight slab + activation carry must fit comfortably;
    # set the scoped-VMEM cap explicitly (v5e default is only 16 MiB).
    slab_bytes = 2 * layers_per_block * N * N * 2
    assert slab_bytes < 24 * 1024 * 1024, "weight slab too large for VMEM budget"
    vmem_limit = 32 * 1024 * 1024

    return pl.pallas_call(
        kernel,
        out_shape=jax.ShapeDtypeStruct((B, N), jnp.float32),
        grid_spec=pltpu.PrefetchScalarGridSpec(
            num_scalar_prefetch=0,
            grid=(batch_blocks, n_layer_blocks),
            in_specs=[
                # Activation input: constant along the layer axis -> fetched once per batch block.
                pl.BlockSpec((bt, N), lambda b, l: (b, 0)),
                # Weight slab: LB layers of (N, N) bf16 per grid step, double-buffered.
                pl.BlockSpec((layers_per_block, N, N), lambda b, l: (l, 0, 0)),
            ],
            # Constant along the layer axis -> resident VMEM activation carry.
            out_specs=pl.BlockSpec((bt, N), lambda b, l: (b, 0)),
        ),
        compiler_params=pltpu.CompilerParams(
            dimension_semantics=("parallel", "arbitrary"),
            vmem_limit_bytes=vmem_limit,
        ),
        cost_estimate=cost,
    )(x, w_in_out_bf16)


def xavier_uniform_weights(key, layers, n, gain):
    """Deterministic xavier_uniform init (matches nn.init.xavier_uniform_)."""
    a = gain * np.sqrt(6.0 / (n + n))
    return jax.random.uniform(
        key, (layers, n, n), dtype=jnp.float32, minval=-a, maxval=a
    )


def mlp_reference_bf16(x, weights):
    """Pure-JAX reference with the kernel's exact numerics:
    bf16 MXU inputs, f32 accumulation, bf16 activation carry."""
    s = x.astype(jnp.bfloat16)
    for i in range(weights.shape[0]):
        w = weights[i].T.astype(jnp.bfloat16)
        h = jnp.dot(s, w, preferred_element_type=jnp.float32)
        s = jnp.tanh(h).astype(jnp.bfloat16)
    return s.astype(jnp.float32)


def mlp_reference_f32(x, weights):
    """Pure-f32 PyTorch-equivalent forward (sans per-layer prints)."""
    for i in range(weights.shape[0]):
        x = jnp.tanh(x @ weights[i].T)
    return x


if __name__ == "__main__":
    LAYERS = 16          # small stand-in for the module's layers=100
    NEURAL_NUM = 256     # matches the module
    BATCH = 128          # rows are ~free up to ~128: lifts arithmetic intensity

    tanh_gain = 5.0 / 3.0  # nn.init.calculate_gain('tanh')

    key = jax.random.PRNGKey(0)
    kx, kw = jax.random.split(key)
    x = jax.random.normal(kx, (BATCH, NEURAL_NUM), dtype=jnp.float32)
    weights = xavier_uniform_weights(kw, LAYERS, NEURAL_NUM, tanh_gain)

    # One-time weight prep outside the hot path (review: do not re-transpose/cast per call).
    w_t = jax.block_until_ready(prepare_weights(weights))

    lb = choose_layers_per_block(LAYERS, NEURAL_NUM)  # -> 4 layers/block, 4 grid steps here
    # TODO(synk): on v7x with a large batch, pass batch_blocks=2 so the leading
    # "parallel" grid axis splits rows across the two TensorCores.
    out = mlp_forward(x, w_t, layers_per_block=lb, batch_blocks=1)
    out = jax.block_until_ready(out)

    # TODO(synk): the per-layer print(x.std()) / NaN breakpoint in the PyTorch
    # forward is a host-side debugging side effect, not reproduced in-kernel.

    # Exact-numerics check (same bf16 weight/activation streaming, f32 accumulation).
    ref = mlp_reference_bf16(x, weights)
    np.testing.assert_allclose(np.asarray(out), np.asarray(ref), rtol=5e-2, atol=5e-2)

    out_np = np.asarray(out)
    assert np.isfinite(out_np).all(), "NaN/Inf found in output"

    # bf16 streaming drifts element-wise from the pure-f32 forward over depth,
    # but the activation statistics the module monitors should agree closely.
    ref32 = np.asarray(mlp_reference_f32(x, weights))
    assert abs(float(out_np.std()) - float(ref32.std())) < 0.05 * max(float(ref32.std()), 1e-3)

    print("KERNEL_OK")
</pallas_src>

<mosaic_0001>
module attributes {stable_mosaic.version = 11 : i64} {
  func.func @mlp_kernel(%arg0: i32, %arg1: i32, %arg2: memref<128x256xf32, #tpu.memory_space<vmem>>, %arg3: memref<4x256x256xbf16, #tpu.memory_space<vmem>>, %arg4: memref<128x256xf32, #tpu.memory_space<vmem>>) attributes {dimension_semantics = [#tpu.dimension_semantics<parallel>, #tpu.dimension_semantics<arbitrary>], iteration_bounds = array<i64: 1, 4>, scalar_prefetch = 0 : i64, scratch_operands = 0 : i64, tpu.core_type = #tpu.core_type<tc>, window_params = [{transform_indices = @transform_0, window_bounds = array<i64: 128, 256>}, {transform_indices = @transform_1, window_bounds = array<i64: 4, 256, 256>}, {transform_indices = @transform_2, window_bounds = array<i64: 128, 256>}]} {
    %c0_i32 = arith.constant 0 : i32
    %0 = arith.cmpi eq, %arg1, %c0_i32 : i32
    %1 = arith.extui %0 : i1 to i32
    %c0_i32_0 = arith.constant 0 : i32
    %2 = arith.cmpi ne, %1, %c0_i32_0 : i32
    scf.if %2 {
      %c0_16 = arith.constant 0 : index
      %c0_17 = arith.constant 0 : index
      %31 = vector.load %arg2[%c0_16, %c0_17] : memref<128x256xf32, #tpu.memory_space<vmem>>, vector<128x256xf32>
      %c0_18 = arith.constant 0 : index
      %c0_19 = arith.constant 0 : index
      %32 = vector.load %arg4[%c0_18, %c0_19] : memref<128x256xf32, #tpu.memory_space<vmem>>, vector<128x256xf32>
      tpu.vector_store %arg4[%c0_18, %c0_19], %31 {strides = array<i32>} : memref<128x256xf32, #tpu.memory_space<vmem>>, vector<128x256xf32>,
    } else {
    }
    %c0 = arith.constant 0 : index
    %c0_1 = arith.constant 0 : index
    %3 = vector.load %arg4[%c0, %c0_1] : memref<128x256xf32, #tpu.memory_space<vmem>>, vector<128x256xf32>
    %4 = arith.truncf %3 : vector<128x256xf32> to vector<128x256xbf16>
    %c0_i32_2 = arith.constant 0 : i32
    %5 = arith.index_cast %c0_i32_2 : i32 to index
    %c0_3 = arith.constant 0 : index
    %c0_4 = arith.constant 0 : index
    %6 = vector.load %arg3[%5, %c0_3, %c0_4] : memref<4x256x256xbf16, #tpu.memory_space<vmem>>, vector<1x256x256xbf16>
    %7 = vector.shape_cast %6 : vector<1x256x256xbf16> to vector<256x256xbf16>
    %cst = arith.constant dense<0.000000e+00> : vector<128x256xf32>
    %8 = tpu.matmul %4, %7, %cst {dimension_numbers = #tpu.dot_dimension_numbers<[1], [0], [0], [1], [0, 0, 1, 1], [], []>} : vector<128x256xbf16>, vector<256x256xbf16>, vector<128x256xf32> -> vector<128x256xf32>
    %9 = math.tanh %8 : vector<128x256xf32>
    %10 = arith.truncf %9 : vector<128x256xf32> to vector<128x256xbf16>
    %c1_i32 = arith.constant 1 : i32
    %11 = arith.index_cast %c1_i32 : i32 to index
    %c0_5 = arith.constant 0 : index
    %c0_6 = arith.constant 0 : index
    %12 = vector.load %arg3[%11, %c0_5, %c0_6] : memref<4x256x256xbf16, #tpu.memory_space<vmem>>, vector<1x256x256xbf16>
    %13 = vector.shape_cast %12 : vector<1x256x256xbf16> to vector<256x256xbf16>
    %cst_7 = arith.constant dense<0.000000e+00> : vector<128x256xf32>
    %14 = tpu.matmul %10, %13, %cst_7 {dimension_numbers = #tpu.dot_dimension_numbers<[1], [0], [0], [1], [0, 0, 1, 1], [], []>} : vector<128x256xbf16>, vector<256x256xbf16>, vector<128x256xf32> -> vector<128x256xf32>
    %15 = math.tanh %14 : vector<128x256xf32>
    %16 = arith.truncf %15 : vector<128x256xf32> to vector<128x256xbf16>
    %c2_i32 = arith.constant 2 : i32
    %17 = arith.index_cast %c2_i32 : i32 to index
    %c0_8 = arith.constant 0 : index
    %c0_9 = arith.constant 0 : index
    %18 = vector.load %arg3[%17, %c0_8, %c0_9] : memref<4x256x256xbf16, #tpu.memory_space<vmem>>, vector<1x256x256xbf16>
    %19 = vector.shape_cast %18 : vector<1x256x256xbf16> to vector<256x256xbf16>
    %cst_10 = arith.constant dense<0.000000e+00> : vector<128x256xf32>
    %20 = tpu.matmul %16, %19, %cst_10 {dimension_numbers = #tpu.dot_dimension_numbers<[1], [0], [0], [1], [0, 0, 1, 1], [], []>} : vector<128x256xbf16>, vector<256x256xbf16>, vector<128x256xf32> -> vector<128x256xf32>
    %21 = math.tanh %20 : vector<128x256xf32>
    %22 = arith.truncf %21 : vector<128x256xf32> to vector<128x256xbf16>
    %c3_i32 = arith.constant 3 : i32
    %23 = arith.index_cast %c3_i32 : i32 to index
    %c0_11 = arith.constant 0 : index
    %c0_12 = arith.constant 0 : index
    %24 = vector.load %arg3[%23, %c0_11, %c0_12] : memref<4x256x256xbf16, #tpu.memory_space<vmem>>, vector<1x256x256xbf16>
    %25 = vector.shape_cast %24 : vector<1x256x256xbf16> to vector<256x256xbf16>
    %cst_13 = arith.constant dense<0.000000e+00> : vector<128x256xf32>
    %26 = tpu.matmul %22, %25, %cst_13 {dimension_numbers = #tpu.dot_dimension_numbers<[1], [0], [0], [1], [0, 0, 1, 1], [], []>} : vector<128x256xbf16>, vector<256x256xbf16>, vector<128x256xf32> -> vector<128x256xf32>
    %27 = math.tanh %26 : vector<128x256xf32>
    %28 = arith.truncf %27 : vector<128x256xf32> to vector<128x256xbf16>
    %c4_i32 = arith.constant 4 : i32
    %29 = arith.extf %28 : vector<128x256xbf16> to vector<128x256xf32>
    %c0_14 = arith.constant 0 : index
    %c0_15 = arith.constant 0 : index
    %30 = vector.load %arg4[%c0_14, %c0_15] : memref<128x256xf32, #tpu.memory_space<vmem>>, vector<128x256xf32>
    tpu.vector_store %arg4[%c0_14, %c0_15], %29 {strides = array<i32>} : memref<128x256xf32, #tpu.memory_space<vmem>>, vector<128x256xf32>,
    return
  }
  func.func @transform_0(%arg0: i32, %arg1: i32) -> (i32, i32) {
    %c0_i32 = arith.constant 0 : i32
    %c0_i32_0 = arith.constant 0 : i32
    return %arg0, %c0_i32 : i32, i32
  }
  func.func @transform_1(%arg0: i32, %arg1: i32) -> (i32, i32, i32) {
    %c0_i32 = arith.constant 0 : i32
    %c0_i32_0 = arith.constant 0 : i32
    %c0_i32_1 = arith.constant 0 : i32
    return %arg1, %c0_i32, %c0_i32_0 : i32, i32, i32
  }
  func.func @transform_2(%arg0: i32, %arg1: i32) -> (i32, i32) {
    %c0_i32 = arith.constant 0 : i32
    %c0_i32_0 = arith.constant 0 : i32
    return %arg0, %c0_i32 : i32, i32
  }
}

</mosaic_0001>

<bundles_post_ra>
// kernel: tpu_custom_call.1
= control target key start
LH: loop header
LB: loop body
LE: loop exit
PB: predicated region body
PF: predicated region fallthrough
CT: control target
= control target key end

     0   :  { %7 = vsyncpa [#allocation3], 0  ;;  %s3129_s0 = inlined_call_operand.hbm [shape: f32[128,256], index: 0, kind: input, shape index: {}]   ;;  %s3130_s1 = inlined_call_operand.hbm [shape: bf16[16,256,256], index: 1, kind: input, shape index: {}]   ;;  %s3131_s2 = inlined_call_operand.hbm [shape: f32[128,256], index: 2, kind: output, shape index: {}]  }
   0x1   :  { %8 = vsyncpa [#allocation6], 0 }
   0x2   :  { %10 = vsyncpa [#allocation6 + $0x1], 0 }
   0x3   :  { %11 = vsyncpa [#allocation4], 0  ;;  %s2815_s9 = smov 0   ;;  %s2817_s10 = smov 0  }
   0x4   :  { %s2819_s11 = smov 0   ;;  %s2821_s12 = smov 0  }
   0x5   :  { %s2823_s13 = smov 0   ;;  %s2825_s14 = smov 0  }
   0x6 LB: > { %s1878_s15 = sadd.s32 4294967295, %s2789_s14   ;;  %p75_p0 = scmp.ne.s32.totalorder %s2773_s10, %s2769_s9  ;;  %s2789_s14 = sphi %s2825_s14, %s17_s14   ;;  %s2785_s13 = sphi %s2823_s13, %s3149_s13   ;;  %s2781_s12 = sphi %s2821_s12, %s3148_s12   ;;  %s2777_s11 = sphi %s2819_s11, %s3147_s11   ;;  %s2773_s10 = sphi %s2817_s10, %s3146_s10   ;;  %s2769_s9 = sphi %s2815_s9, %s3145_s9  }
   0x7   : > { %p2847_p1 = scmp.eq.s32.totalorder %s1878_s15, 0  ;;  %p1879_p2 = scmp.ge.s32.totalorder %s2789_s14, 1 }
   0x8   : > { %p112_p3 = scmp.lt.s32.totalorder %s2789_s14, 5  ;;  %s2791_s19 = smov [#allocation2]  }
   0x9   : > { %s3136_s16 = scalar_select %p2847_p1, 1, 0 }
   0xa   : > { %p2855_p4 = por %p2847_p1, %p75_p0  ;;  %p2859_p5 = pnand %p1879_p2, %p112_p3 }
   0xb   : > { %s128_s20 = sshll.u32 %s2791_s19, 4  ;;  %s26_s22 = sadd.s32 1, %s2785_s13  ;;  %s129_s20 = int_to_ptr.vmem [resolvable:$true] %s128_s20 }
   0xc   : > { %s3137_s17 = scalar_select %p2855_p4, 1, 0 }
   0xd   : > { %s3138_s18 = scalar_select %p2859_p5, 1, 0 }
   0xe   : > { %p2130_p6 = pneg %p2859_p5  ;;  %s2647_s25 = scalar_lea.hbm %s3129_s0, 4096 }
   0xf   : > { %p2648_p8 = scmp.ne.s32.totalorder %s3129_s0, %s2647_s25  ;;  %p2654_p12 = scmp.lt.u32.totalorder %s2647_s25, %s3129_s0 }
  0x10   : > { %p2867_p7 = pnand %p2130_p6, %p2847_p1 }
  0x12   : > { %p2649_p9 = pneg %p2867_p7 }
  0x14   : > { %p2650_p10 = pnand %p2649_p9, %p2648_p8 }
  0x16   : > { %p2651_p11 = pneg %p2650_p10 }
  0x18   : > { %p2656_p13 = pnand %p2654_p12, %p2651_p11 }
  0x1a   : > { %2659 = shalt.err (!%p2656_p13)
}
  0x1b   : > { %s2660_s30 = scalar_lea.vmem %s129_s20, 4096  ;;  %p2668_p6 = scmp.lt.s32.totalorder %s129_s20, %s129_s20 }
  0x1c   : > { %p2661_p0 = scmp.ne.s32.totalorder %s129_s20, %s2660_s30  ;;  %p2669_p4 = scmp.lt.s32.totalorder %s2660_s30, %s2660_s30 }
  0x1e   : > { %p2663_p2 = pnand %p2661_p0, %p2649_p9  ;;  %p2670_p1 = por %p2669_p4, %p2668_p6 }
  0x20   : > { %p2664_p3 = pneg %p2663_p2 }
  0x22   : > { %p2671_p5 = pnand %p2670_p1, %p2664_p3 }
  0x24   : > { %2674 = shalt.err (!%p2671_p5)
}
  0x25   : > { %s2792_s3 = smov 256   ;;  %s2793_s4 = smov 16  }
  0x26   : > { %2133 = dma.hbm_to_vmem [thread:$0]  (!%p2867_p7), %s3129_s0, 4096, %s129_s20, [#allocation3], %s2792_s3, %s2792_s3, %s2793_s4  }
  0x27   : > { %p27_p4 = scmp.ge.s32.totalorder %s26_s22, 4  ;;  %s62_s7 = sadd.s32 1, %s2777_s11 }
  0x28   : > { %p69_p1 = scmp.ne.s32.totalorder %s2777_s11, %s2773_s10  ;;  %p70_p5 = scmp.eq.s32.totalorder %s2789_s14, 0 }
  0x29   : > { %s3151_s22 = smov (%p27_p4, %s26_s22), 0  ;;  %p2139_p9 = scmp.lt.s32.totalorder %s2789_s14, 4 }
  0x2a   : > { %p71_p8 = por %p70_p5, %p69_p1  ;;  %s59_s8 = ssub.s32 %s2785_s13, %s3151_s22 }
  0x2b   : > { %s142_s9 = sand.u32 1, %s2777_s11   ;;  %p60_p10 = scmp.eq.s32.totalorder %s59_s8, 0 }
  0x2c   : > { %s1882_s19 = sshll.u32 %s142_s9, 10  ;;  %s2119_s23 = sshll.u32 %s2785_s13, 14 }
  0x2d   : > { %s2900_s24 = scalar_select %p60_p10, %s2777_s11, %s62_s7  }
  0x2e   : > { %s2905_s20 = scalar_lea.hbm %s3130_s1, %s2119_s23  ;;  %s146_s26 = scalar_lea.vmem [#allocation5], %s1882_s19 }
  0x2f   : > { %s154_s27 = sshll.u32 %s146_s26, 4  ;;  %p2907_p7 = pnand %p2139_p9, %p71_p8  ;;  %s2911_s27 = int_to_ptr.vmem [resolvable:$true] %s154_s27 }
  0x30   : > { %s2913_s29 = scalar_lea.sflag [#allocation6], %s142_s9  ;;  %s2675_s30 = scalar_lea.hbm %s2905_s20, 16384 }
  0x31   : > { %p2676_p11 = scmp.ne.s32.totalorder %s2905_s20, %s2675_s30  ;;  %p2677_p12 = pneg %p2907_p7 }
  0x32   : > { %s2680_s5 = scalar_lea.hbm %s3130_s1, 65536  ;;  %p2681_p2 = scmp.lt.u32.totalorder %s2905_s20, %s3130_s1 }
  0x33   : > { %p2678_p13 = pnand %p2677_p12, %p2676_p11  ;;  %p2682_p3 = scmp.lt.u32.totalorder %s2680_s5, %s2675_s30 }
  0x34   : > { %p2684_p4 = scmp.lt.u32.totalorder %s2675_s30, %s2905_s20 }
  0x35   : > { %p2679_p0 = pneg %p2678_p13  ;;  %p2683_p6 = por %p2682_p3, %p2681_p2 }
  0x37   : > { %p2685_p1 = por %p2684_p4, %p2683_p6 }
  0x39   : > { %p2686_p5 = pnand %p2685_p1, %p2679_p0 }
  0x3b   : > { %2689 = shalt.err (!%p2686_p5)
}
  0x3c   : > { %s2690_s8 = scalar_lea.vmem %s2911_s27, 16384  ;;  %s2794_s9 = smov [#allocation5]  }
  0x3d   : > { %p2691_p8 = scmp.ne.s32.totalorder %s2911_s27, %s2690_s8  ;;  %s2695_s19 = sshll.u32 %s2794_s9, 4  ;;  %s2696_s19 = int_to_ptr.vmem [resolvable:$false] %s2695_s19 }
  0x3e   : > { %s2697_s23 = scalar_lea.vmem %s2696_s19, 32768  ;;  %p2698_p11 = scmp.lt.s32.totalorder %s2911_s27, %s2696_s19 }
  0x3f   : > { %p2693_p9 = pnand %p2691_p8, %p2677_p12  ;;  %p2699_p13 = scmp.lt.s32.totalorder %s2697_s23, %s2690_s8 }
  0x41   : > { %p2694_p10 = pneg %p2693_p9  ;;  %p2700_p2 = por %p2699_p13, %p2698_p11 }
  0x43   : > { %p2701_p3 = pnand %p2700_p2, %p2694_p10 }
  0x45   : > { %2704 = shalt.err (!%p2701_p3)
}
  0x46   : > { %s2795_s21 = smov 128   ;;  %s2796_s25 = smov 8  }
  0x47   : > { %2137 = dma.hbm_to_vmem [thread:$0]  (!%p2907_p7), %s2905_s20, 16384, %s2911_s27, %s2913_s29, %s2795_s21, %s2795_s21, %s2796_s25  }
  0x48   : > { %p3141_p12 = scmp.ne.s32.totalorder %s3138_s18, 0 }
  0x49   : > { %p3142_p0 = scmp.ne.s32.totalorder (!%p3141_p12), %s3136_s16, 0 }
  0x4a   : > { %166 = sbr.rel (%p3141_p12) target bundleno = 1158 (0x486), region = 28 }
  0x51   : > { %2756 = dma.done.wait (%p3142_p0), [#allocation3], 4096  }
  0x52   : > { %2758 = vsyncadd (%p3142_p0), [#allocation3], 4294963200  ;;  %s172_s26 = sand.u32 1, %s2773_s10   ;;  %p3143_p6 = scmp.ne.s32.totalorder %s3137_s17, 0 }
  0x53   : > { %s1888_s30 = sshll.u32 %s172_s26, 10  ;;  %s173_s3 = scalar_lea.sflag [#allocation6], %s172_s26 }
  0x54   : > { %s2948_s4 = scalar_lea.vmem [#allocation5], %s1888_s30 }
  0x55   : > { %2760 = dma.done.wait (%p3143_p6), %s173_s3, 16384  }
  0x56   : > { %2762 = vsyncadd (%p3143_p6), %s173_s3, 4294950912  ;;  %p1889_p7 = scmp.ne.s32.totalorder %s2781_s12, 0 }
  0x57   : > { %v199_v0 = vld [vmem:[#allocation2] sm:$0xff] (!%p1889_p7)  ;;  %v200_v1 = vld [vmem:[#allocation2 + $0x8] sm:$0xff] (!%p1889_p7)  ;;  %v201_v2 = vld [vmem:[#allocation2 + $0x10] sm:$0xff] (!%p1889_p7) }
  0x58   : > { %198 = sbr.rel (%p1889_p7) target bundleno = 104 (0x68), region = 40  ;;  %231 = vst [vmem:[#allocation7] sm:$0xff] (!%p1889_p7), %v199_v0  ;;  %232 = vst [vmem:[#allocation7 + $0x8] sm:$0xff] (!%p1889_p7), %v200_v1  ;;  %v202_v3 = vld [vmem:[#allocation2 + $0x18] sm:$0xff] (!%p1889_p7)  ;;  %v203_v4 = vld [vmem:[#allocation2 + $0x20] sm:$0xff] (!%p1889_p7) }
  0x59   : > { %233 = vst [vmem:[#allocation7 + $0x10] sm:$0xff] (!%p1889_p7), %v201_v2  ;;  %v204_v5 = vld [vmem:[#allocation2 + $0x28] sm:$0xff] (!%p1889_p7)  ;;  %234 = vst [vmem:[#allocation7 + $0x18] sm:$0xff] (!%p1889_p7), %v202_v3  ;;  %v205_v6 = vld [vmem:[#allocation2 + $0x30] sm:$0xff] (!%p1889_p7) }
  0x5a   : > { %235 = vst [vmem:[#allocation7 + $0x20] sm:$0xff] (!%p1889_p7), %v203_v4  ;;  %236 = vst [vmem:[#allocation7 + $0x28] sm:$0xff] (!%p1889_p7), %v204_v5  ;;  %v206_v7 = vld [vmem:[#allocation2 + $0x38] sm:$0xff] (!%p1889_p7)  ;;  %v207_v8 = vld [vmem:[#allocation2 + $0x40] sm:$0xff] (!%p1889_p7) }
  0x5b   : > { %237 = vst [vmem:[#allocation7 + $0x30] sm:$0xff] (!%p1889_p7), %v205_v6  ;;  %238 = vst [vmem:[#allocation7 + $0x38] sm:$0xff] (!%p1889_p7), %v206_v7  ;;  %v208_v9 = vld [vmem:[#allocation2 + $0x48] sm:$0xff] (!%p1889_p7)  ;;  %v209_v10 = vld [vmem:[#allocation2 + $0x50] sm:$0xff] (!%p1889_p7) }
  0x5c   : > { %239 = vst [vmem:[#allocation7 + $0x40] sm:$0xff] (!%p1889_p7), %v207_v8  ;;  %v210_v11 = vld [vmem:[#allocation2 + $0x58] sm:$0xff] (!%p1889_p7)  ;;  %240 = vst [vmem:[#allocation7 + $0x48] sm:$0xff] (!%p1889_p7), %v208_v9  ;;  %v211_v12 = vld [vmem:[#allocation2 + $0x60] sm:$0xff] (!%p1889_p7) }
  0x5d   : > { %241 = vst [vmem:[#allocation7 + $0x50] sm:$0xff] (!%p1889_p7), %v209_v10  ;;  %242 = vst [vmem:[#allocation7 + $0x58] sm:$0xff] (!%p1889_p7), %v210_v11  ;;  %v212_v13 = vld [vmem:[#allocation2 + $0x68] sm:$0xff] (!%p1889_p7)  ;;  %v213_v14 = vld [vmem:[#allocation2 + $0x70] sm:$0xff] (!%p1889_p7) }
  0x5e   : > { %243 = vst [vmem:[#allocation7 + $0x60] sm:$0xff] (!%p1889_p7), %v211_v12  ;;  %244 = vst [vmem:[#allocation7 + $0x68] sm:$0xff] (!%p1889_p7), %v212_v13  ;;  %v214_v15 = vld [vmem:[#allocation2 + $0x78] sm:$0xff] (!%p1889_p7)  ;;  %v215_v16 = vld [vmem:[#allocation2 + $0x80] sm:$0xff] (!%p1889_p7) }
  0x5f   : > { %245 = vst [vmem:[#allocation7 + $0x70] sm:$0xff] %v213_v14  ;;  %v216_v17 = vld [vmem:[#allocation2 + $0x88] sm:$0xff]  ;;  %246 = vst [vmem:[#allocation7 + $0x78] sm:$0xff] %v214_v15  ;;  %v217_v18 = vld [vmem:[#allocation2 + $0x90] sm:$0xff] }
  0x60   : > { %247 = vst [vmem:[#allocation7 + $0x80] sm:$0xff] %v215_v16  ;;  %248 = vst [vmem:[#allocation7 + $0x88] sm:$0xff] %v216_v17  ;;  %v218_v19 = vld [vmem:[#allocation2 + $0x98] sm:$0xff]  ;;  %v219_v20 = vld [vmem:[#allocation2 + $0xa0] sm:$0xff] }
  0x61   : > { %249 = vst [vmem:[#allocation7 + $0x90] sm:$0xff] %v217_v18  ;;  %250 = vst [vmem:[#allocation7 + $0x98] sm:$0xff] %v218_v19  ;;  %v220_v21 = vld [vmem:[#allocation2 + $0xa8] sm:$0xff]  ;;  %v221_v22 = vld [vmem:[#allocation2 + $0xb0] sm:$0xff] }
  0x62   : > { %251 = vst [vmem:[#allocation7 + $0xa0] sm:$0xff] %v219_v20  ;;  %v222_v23 = vld [vmem:[#allocation2 + $0xb8] sm:$0xff]  ;;  %252 = vst [vmem:[#allocation7 + $0xa8] sm:$0xff] %v220_v21  ;;  %v223_v24 = vld [vmem:[#allocation2 + $0xc0] sm:$0xff] }
  0x63   : > { %253 = vst [vmem:[#allocation7 + $0xb0] sm:$0xff] %v221_v22  ;;  %254 = vst [vmem:[#allocation7 + $0xb8] sm:$0xff] %v222_v23  ;;  %v224_v25 = vld [vmem:[#allocation2 + $0xc8] sm:$0xff]  ;;  %v225_v26 = vld [vmem:[#allocation2 + $0xd0] sm:$0xff] }
  0x64   : > { %255 = vst [vmem:[#allocation7 + $0xc0] sm:$0xff] %v223_v24  ;;  %256 = vst [vmem:[#allocation7 + $0xc8] sm:$0xff] %v224_v25  ;;  %v226_v27 = vld [vmem:[#allocation2 + $0xd8] sm:$0xff]  ;;  %v227_v28 = vld [vmem:[#allocation2 + $0xe0] sm:$0xff] }
  0x65   : > { %257 = vst [vmem:[#allocation7 + $0xd0] sm:$0xff] %v225_v26  ;;  %v228_v29 = vld [vmem:[#allocation2 + $0xe8] sm:$0xff]  ;;  %258 = vst [vmem:[#allocation7 + $0xd8] sm:$0xff] %v226_v27  ;;  %v229_v30 = vld [vmem:[#allocation2 + $0xf0] sm:$0xff] }
  0x66   : > { %259 = vst [vmem:[#allocation7 + $0xe0] sm:$0xff] %v227_v28  ;;  %260 = vst [vmem:[#allocation7 + $0xe8] sm:$0xff] %v228_v29  ;;  %v230_v31 = vld [vmem:[#allocation2 + $0xf8] sm:$0xff] }
  0x67   : > { %261 = vst [vmem:[#allocation7 + $0xf0] sm:$0xff] %v229_v30  ;;  %262 = vst [vmem:[#allocation7 + $0xf8] sm:$0xff] %v230_v31 }
  0x68 PF: > { %v2199_v32 = vld [vmem:[%s2948_s4 + $0x4] ss:$8 sps:$4 sm:$0xff]   ;;  %v2201_v33 = vld [vmem:[%s2948_s4] ss:$8 sps:$4 sm:$0xff]   ;;  %v2202_v34 = vld [vmem:[%s2948_s4 + $0x14] ss:$8 sps:$4 sm:$0xff]  }
  0x69   : > { %503 = vmatprep.subr.bf16.mxu0 %v2199_v32  ;;  %v2204_v35 = vld [vmem:[%s2948_s4 + $0x10] ss:$8 sps:$4 sm:$0xff]   ;;  %v2205_v36 = vld [vmem:[%s2948_s4 + $0x24] ss:$8 sps:$4 sm:$0xff]   ;;  %v2207_v37 = vld [vmem:[%s2948_s4 + $0x20] ss:$8 sps:$4 sm:$0xff]  }
  0x6a   : > { %504 = vmatpush1.bf16.msra.mxu0 %v2201_v33  ;;  %v2208_v38 = vld [vmem:[%s2948_s4 + $0x34] ss:$8 sps:$4 sm:$0xff]   ;;  %v2210_v39 = vld [vmem:[%s2948_s4 + $0x30] ss:$8 sps:$4 sm:$0xff]   ;;  %v2211_v40 = vld [vmem:[%s2948_s4 + $0x44] ss:$8 sps:$4 sm:$0xff]  }
  0x6b   : > { %505 = vmatprep.subr.bf16.mxu0 %v2202_v34  ;;  %v2213_v41 = vld [vmem:[%s2948_s4 + $0x40] ss:$8 sps:$4 sm:$0xff]   ;;  %v2214_v42 = vld [vmem:[%s2948_s4 + $0x54] ss:$8 sps:$4 sm:$0xff]   ;;  %v2216_v43 = vld [vmem:[%s2948_s4 + $0x50] ss:$8 sps:$4 sm:$0xff]  }
  0x6c   : > { %v2217_v44 = vld [vmem:[%s2948_s4 + $0x64] ss:$8 sps:$4 sm:$0xff]   ;;  %v266_v46 = vld [vmem:[#allocation7 + $0x18] sm:$0xff]  ;;  %v2219_v48 = vld [vmem:[%s2948_s4 + $0x60] ss:$8 sps:$4 sm:$0xff]   ;;  %s2797_s12 = smov [#allocation7]  }
  0x6d   : > { %v264_v45 = vld [vmem:[#allocation7 + $0x8] sm:$0xff]  ;;  %v2220_v49 = vld [vmem:[%s2948_s4 + $0x74] ss:$8 sps:$4 sm:$0xff]   ;;  %v2222_v50 = vld [vmem:[%s2948_s4 + $0x70] ss:$8 sps:$4 sm:$0xff]   ;;  %s1800_s16 = sshll.u32 %s2797_s12, 4  ;;  %s1801_s16 = int_to_ptr.vmem [resolvable:$true] %s1800_s16 }
  0x6e   : > { %506 = vmatpush1.bf16.msra.mxu0 %v2204_v35  ;;  %v296_v47 = vpack.c.bf16 %v266_v46, %v264_v45  ;;  %v2223_v51 = vld [vmem:[%s2948_s4 + $0x84] ss:$8 sps:$4 sm:$0xff]   ;;  %v2225_v52 = vld [vmem:[%s2948_s4 + $0x80] ss:$8 sps:$4 sm:$0xff]   ;;  %v2226_v53 = vld [vmem:[%s2948_s4 + $0x94] ss:$8 sps:$4 sm:$0xff]   ;;  %p2712_p9 = scmp.lt.s32.totalorder %s1801_s16, %s1801_s16 }
  0x6f   : > { %507 = vmatprep.subr.bf16.mxu0 %v2205_v36  ;;  %v2247_v54 = vld [vmem:[%s2948_s4 + $0x104] ss:$8 sps:$4 sm:$0xff]   ;;  %v2249_v55 = vld [vmem:[%s2948_s4 + $0x100] ss:$8 sps:$4 sm:$0xff]   ;;  %v2228_v56 = vld [vmem:[%s2948_s4 + $0x90] ss:$8 sps:$4 sm:$0xff]  }
  0x70   : > { %535 = vmatprep.mubr.bf16.mxu0 %v296_v47  ;;  %857 = vmatprep.subr.bf16.mxu1 %v2247_v54  ;;  %v2250_v57 = vld [vmem:[%s2948_s4 + $0x114] ss:$8 sps:$4 sm:$0xff]   ;;  %v2229_v58 = vld [vmem:[%s2948_s4 + $0xa4] ss:$8 sps:$4 sm:$0xff]   ;;  %v2252_v59 = vld [vmem:[%s2948_s4 + $0x110] ss:$8 sps:$4 sm:$0xff]  }
  0x71   : > { %858 = vmatpush1.bf16.msra.mxu1 %v2249_v55  ;;  %v2253_v60 = vld [vmem:[%s2948_s4 + $0x124] ss:$8 sps:$4 sm:$0xff]   ;;  %v2231_v61 = vld [vmem:[%s2948_s4 + $0xa0] ss:$8 sps:$4 sm:$0xff]   ;;  %v2232_v62 = vld [vmem:[%s2948_s4 + $0xb4] ss:$8 sps:$4 sm:$0xff]  }
  0x72   : > { %508 = vmatpush1.bf16.msra.mxu0 %v2207_v37  ;;  %859 = vmatprep.subr.bf16.mxu1 %v2250_v57  ;;  %v2255_v63 = vld [vmem:[%s2948_s4 + $0x120] ss:$8 sps:$4 sm:$0xff]   ;;  %v2256_v0 = vld [vmem:[%s2948_s4 + $0x134] ss:$8 sps:$4 sm:$0xff]   ;;  %v2234_v1 = vld [vmem:[%s2948_s4 + $0xb0] ss:$8 sps:$4 sm:$0xff]  }
  0x73   : > { %509 = vmatprep.subr.bf16.mxu0 %v2208_v38  ;;  %v2235_v2 = vld [vmem:[%s2948_s4 + $0xc4] ss:$8 sps:$4 sm:$0xff]   ;;  %v2258_v3 = vld [vmem:[%s2948_s4 + $0x130] ss:$8 sps:$4 sm:$0xff]   ;;  %v2237_v5 = vld [vmem:[%s2948_s4 + $0xc0] ss:$8 sps:$4 sm:$0xff]  }
  0x74   : > { %v2259_v4 = vld [vmem:[%s2948_s4 + $0x144] ss:$8 sps:$4 sm:$0xff]   ;;  %v2238_v6 = vld [vmem:[%s2948_s4 + $0xd4] ss:$8 sps:$4 sm:$0xff]   ;;  %v2261_v7 = vld [vmem:[%s2948_s4 + $0x140] ss:$8 sps:$4 sm:$0xff]  }
  0x75   : > { %860 = vmatpush1.bf16.msra.mxu1 %v2252_v59  ;;  %v2262_v8 = vld [vmem:[%s2948_s4 + $0x154] ss:$8 sps:$4 sm:$0xff]   ;;  %v2240_v9 = vld [vmem:[%s2948_s4 + $0xd0] ss:$8 sps:$4 sm:$0xff]   ;;  %v2241_v11 = vld [vmem:[%s2948_s4 + $0xe4] ss:$8 sps:$4 sm:$0xff]  }
  0x76   : > { %510 = vmatpush1.bf16.msra.mxu0 %v2210_v39  ;;  %861 = vmatprep.subr.bf16.mxu1 %v2253_v60  ;;  %v2264_v10 = vld [vmem:[%s2948_s4 + $0x150] ss:$8 sps:$4 sm:$0xff]   ;;  %v2265_v12 = vld [vmem:[%s2948_s4 + $0x164] ss:$8 sps:$4 sm:$0xff]   ;;  %v2243_v13 = vld [vmem:[%s2948_s4 + $0xe0] ss:$8 sps:$4 sm:$0xff]  }
  0x77   : > { %511 = vmatprep.subr.bf16.mxu0 %v2211_v40  ;;  %v2267_v14 = vld [vmem:[%s2948_s4 + $0x160] ss:$8 sps:$4 sm:$0xff]   ;;  %v2244_v15 = vld [vmem:[%s2948_s4 + $0xf4] ss:$8 sps:$4 sm:$0xff]   ;;  %v2246_v17 = vld [vmem:[%s2948_s4 + $0xf0] ss:$8 sps:$4 sm:$0xff]  }
  0x78   : > { %v2268_v16 = vld [vmem:[%s2948_s4 + $0x174] ss:$8 sps:$4 sm:$0xff]   ;;  %v263_v18 = vld [vmem:[#allocation7] sm:$0xff]  ;;  %v2270_v20 = vld [vmem:[%s2948_s4 + $0x170] ss:$8 sps:$4 sm:$0xff]   ;;  %p3085_p4 = scmp.eq.s32.totalorder %s1878_s15, 3 }
  0x79   : > { %862 = vmatpush1.bf16.msra.mxu1 %v2255_v63  ;;  %v265_v19 = vld [vmem:[#allocation7 + $0x10] sm:$0xff]  ;;  %v268_v21 = vld [vmem:[#allocation7 + $0x28] sm:$0xff]  ;;  %v270_v22 = vld [vmem:[#allocation7 + $0x38] sm:$0xff]  ;;  %s2705_s18 = scalar_lea.vmem %s1801_s16, 4096 }
  0x7a   : > { %512 = vmatpush1.bf16.msra.mxu0 %v2213_v41  ;;  %863 = vmatprep.subr.bf16.mxu1 %v2256_v0  ;;  %v2271_v23 = vld [vmem:[%s2948_s4 + $0x184] ss:$8 sps:$4 sm:$0xff]   ;;  %v2273_v24 = vld [vmem:[%s2948_s4 + $0x180] ss:$8 sps:$4 sm:$0xff]   ;;  %v295_v25 = vpack.c.bf16 %v265_v19, %v263_v18  ;;  %v2274_v26 = vld [vmem:[%s2948_s4 + $0x194] ss:$8 sps:$4 sm:$0xff]   ;;  %v298_v27 = vpack.c.bf16 %v270_v22, %v268_v21  ;;  %p2706_p1 = scmp.ne.s32.totalorder %s1801_s16, %s2705_s18  ;;  %p2713_p10 = scmp.lt.s32.totalorder %s2705_s18, %s2705_s18 }
  0x7b   : > { %513 = vmatprep.subr.bf16.mxu0 %v2214_v42  ;;  %v267_v28 = vld [vmem:[#allocation7 + $0x20] sm:$0xff]  ;;  %v269_v29 = vld [vmem:[#allocation7 + $0x30] sm:$0xff]  ;;  %v272_v31 = vld [vmem:[#allocation7 + $0x48] sm:$0xff] }
  0x7c   : > { %v2276_v30 = vld [vmem:[%s2948_s4 + $0x190] ss:$8 sps:$4 sm:$0xff]   ;;  %v2277_v33 = vld [vmem:[%s2948_s4 + $0x1a4] ss:$8 sps:$4 sm:$0xff]   ;;  %v2279_v34 = vld [vmem:[%s2948_s4 + $0x1a0] ss:$8 sps:$4 sm:$0xff]   ;;  %v297_v35 = vpack.c.bf16 %v269_v29, %v267_v28  ;;  %p2707_p5 = pnand %p2706_p1, %p3085_p4  ;;  %p2714_p11 = por %p2713_p10, %p2712_p9 }
  0x7d   : > { %864 = vmatpush1.bf16.msra.mxu1 %v2258_v3  ;;  %v274_v32 = vld [vmem:[#allocation7 + $0x58] sm:$0xff]  ;;  %v271_v38 = vld [vmem:[#allocation7 + $0x40] sm:$0xff]  ;;  %v273_v39 = vld [vmem:[#allocation7 + $0x50] sm:$0xff] }
  0x7e   : > { %514 = vmatpush1.bf16.msra.mxu0 %v2216_v43  ;;  %865 = vmatprep.subr.bf16.mxu1 %v2259_v4  ;;  %v300_v36 = vpack.c.bf16 %v274_v32, %v272_v31  ;;  %v2280_v37 = vld [vmem:[%s2948_s4 + $0x1b4] ss:$8 sps:$4 sm:$0xff]   ;;  %v2282_v40 = vld [vmem:[%s2948_s4 + $0x1b0] ss:$8 sps:$4 sm:$0xff]   ;;  %v276_v41 = vld [vmem:[#allocation7 + $0x68] sm:$0xff]  ;;  %v299_v43 = vpack.c.bf16 %v273_v39, %v271_v38  ;;  %p2708_p8 = pneg %p2707_p5 }
  0x7f   : > { %515 = vmatprep.subr.bf16.mxu0 %v2217_v44  ;;  %v278_v42 = vld [vmem:[#allocation7 + $0x78] sm:$0xff]  ;;  %v275_v45 = vld [vmem:[#allocation7 + $0x60] sm:$0xff]  ;;  %v277_v46 = vld [vmem:[#allocation7 + $0x70] sm:$0xff] }
  0x80   : > { %v302_v44 = vpack.c.bf16 %v278_v42, %v276_v41  ;;  %v280_v47 = vld [vmem:[#allocation7 + $0x88] sm:$0xff]  ;;  %v286_v54 = vld [vmem:[#allocation7 + $0xb8] sm:$0xff]  ;;  %v283_v57 = vld [vmem:[#allocation7 + $0xa0] sm:$0xff]  ;;  %p2715_p13 = pnand %p2714_p11, %p2708_p8 }
  0x81   : > { %866 = vmatpush1.bf16.msra.mxu1 %v2261_v7  ;;  %v288_v59 = vld [vmem:[#allocation7 + $0xc8] sm:$0xff]  ;;  %v290_v60 = vld [vmem:[#allocation7 + $0xd8] sm:$0xff]  ;;  %v287_v63 = vld [vmem:[#allocation7 + $0xc0] sm:$0xff] }
  0x82   : > { %516 = vmatpush1.bf16.msra.mxu0 %v2219_v48  ;;  %867 = vmatprep.subr.bf16.mxu1 %v2262_v8  ;;  %v282_v48 = vld [vmem:[#allocation7 + $0x98] sm:$0xff]  ;;  %v289_v0 = vld [vmem:[#allocation7 + $0xd0] sm:$0xff]  ;;  %v2283_v8 = vld [vmem:[%s2948_s4 + $0x1c4] ss:$8 sps:$4 sm:$0xff]  }
  0x83   : > { %517 = vmatprep.subr.bf16.mxu0 %v2220_v49  ;;  %v301_v49 = vpack.c.bf16 %v277_v46, %v275_v45  ;;  %v307_v3 = vpack.c.bf16 %v289_v0, %v287_v63  ;;  %v2300_v18 = vld [vmem:[%s2948_s4 + $0x214] ss:$8 sps:$4 sm:$0xff]   ;;  %v2298_v19 = vld [vmem:[%s2948_s4 + $0x210] ss:$8 sps:$4 sm:$0xff]   ;;  %v2301_v21 = vld [vmem:[%s2948_s4 + $0x220] ss:$8 sps:$4 sm:$0xff]  }
  0x84   : > { %v2306_v22 = vld [vmem:[%s2948_s4 + $0x234] ss:$8 sps:$4 sm:$0xff]   ;;  %v2315_v28 = vld [vmem:[%s2948_s4 + $0x264] ss:$8 sps:$4 sm:$0xff]   ;;  %v2313_v29 = vld [vmem:[%s2948_s4 + $0x260] ss:$8 sps:$4 sm:$0xff]  }
  0x85   : > { %868 = vmatpush1.bf16.msra.mxu1 %v2264_v10  ;;  %v2286_v10 = vld [vmem:[%s2948_s4 + $0x1d4] ss:$8 sps:$4 sm:$0xff]   ;;  %v2316_v31 = vld [vmem:[%s2948_s4 + $0x270] ss:$8 sps:$4 sm:$0xff]   ;;  %v2321_v32 = vld [vmem:[%s2948_s4 + $0x284] ss:$8 sps:$4 sm:$0xff]  }
  0x86   : > { %518 = vmatpush1.bf16.msra.mxu0 %v2222_v50  ;;  %869 = vmatprep.subr.bf16.mxu1 %v2265_v12  ;;  %v304_v50 = vpack.c.bf16 %v282_v48, %v280_v47  ;;  %v2289_v12 = vld [vmem:[%s2948_s4 + $0x1e4] ss:$8 sps:$4 sm:$0xff]   ;;  %v2330_v38 = vld [vmem:[%s2948_s4 + $0x2b4] ss:$8 sps:$4 sm:$0xff]   ;;  %v2328_v39 = vld [vmem:[%s2948_s4 + $0x2b0] ss:$8 sps:$4 sm:$0xff]  }
  0x87   : > { %519 = vmatprep.subr.bf16.mxu0 %v2223_v51  ;;  %v279_v51 = vld [vmem:[#allocation7 + $0x80] sm:$0xff] }
  0x89   : > { %870 = vmatpush1.bf16.msra.mxu1 %v2267_v14  ;;  %v2292_v14 = vld [vmem:[%s2948_s4 + $0x1f4] ss:$8 sps:$4 sm:$0xff]  }
  0x8a   : > { %520 = vmatpush1.bf16.msra.mxu0 %v2225_v52  ;;  %871 = vmatprep.subr.bf16.mxu1 %v2268_v16  ;;  %v281_v52 = vld [vmem:[#allocation7 + $0x90] sm:$0xff]  ;;  %v2295_v16 = vld [vmem:[%s2948_s4 + $0x200] ss:$8 sps:$4 sm:$0xff]  }
  0x8b   : > { %521 = vmatprep.subr.bf16.mxu0 %v2226_v53  ;;  %v284_v53 = vld [vmem:[#allocation7 + $0xa8] sm:$0xff]  ;;  %v303_v55 = vpack.c.bf16 %v281_v52, %v279_v51 }
  0x8d   : > { %872 = vmatpush1.bf16.msra.mxu1 %v2270_v20  ;;  %v2303_v20 = vld [vmem:[%s2948_s4 + $0x224] ss:$8 sps:$4 sm:$0xff]  }
  0x8e   : > { %522 = vmatpush1.bf16.msra.mxu0 %v2228_v56  ;;  %873 = vmatprep.subr.bf16.mxu1 %v2271_v23  ;;  %v306_v56 = vpack.c.bf16 %v286_v54, %v284_v53  ;;  %v2304_v23 = vld [vmem:[%s2948_s4 + $0x230] ss:$8 sps:$4 sm:$0xff]  }
  0x8f   : > { %523 = vmatprep.subr.bf16.mxu0 %v2229_v58  ;;  %v285_v58 = vld [vmem:[#allocation7 + $0xb0] sm:$0xff] }
  0x91   : > { %874 = vmatpush1.bf16.msra.mxu1 %v2273_v24  ;;  %v2309_v24 = vld [vmem:[%s2948_s4 + $0x244] ss:$8 sps:$4 sm:$0xff]  }
  0x92   : > { %524 = vmatpush1.bf16.msra.mxu0 %v2231_v61  ;;  %875 = vmatprep.subr.bf16.mxu1 %v2274_v26  ;;  %v305_v61 = vpack.c.bf16 %v285_v58, %v283_v57  ;;  %v2312_v26 = vld [vmem:[%s2948_s4 + $0x254] ss:$8 sps:$4 sm:$0xff]  }
  0x93   : > { %525 = vmatprep.subr.bf16.mxu0 %v2232_v62  ;;  %v308_v62 = vpack.c.bf16 %v290_v60, %v288_v59 }
  0x95   : > { %876 = vmatpush1.bf16.msra.mxu1 %v2276_v30  ;;  %v2318_v30 = vld [vmem:[%s2948_s4 + $0x274] ss:$8 sps:$4 sm:$0xff]  }
  0x96   : > { %526 = vmatpush1.bf16.msra.mxu0 %v2234_v1  ;;  %877 = vmatprep.subr.bf16.mxu1 %v2277_v33  ;;  %v292_v1 = vld [vmem:[#allocation7 + $0xe8] sm:$0xff] }
  0x97   : > { %527 = vmatprep.subr.bf16.mxu0 %v2235_v2  ;;  %v294_v2 = vld [vmem:[#allocation7 + $0xf8] sm:$0xff]  ;;  %v2319_v33 = vld [vmem:[%s2948_s4 + $0x280] ss:$8 sps:$4 sm:$0xff]  }
  0x98   : > { %v310_v4 = vpack.c.bf16 %v294_v2, %v292_v1 }
  0x99   : > { %878 = vmatpush1.bf16.msra.mxu1 %v2279_v34  ;;  %v2324_v34 = vld [vmem:[%s2948_s4 + $0x294] ss:$8 sps:$4 sm:$0xff]  }
  0x9a   : > { %528 = vmatpush1.bf16.msra.mxu0 %v2237_v5  ;;  %879 = vmatprep.subr.bf16.mxu1 %v2280_v37  ;;  %v291_v5 = vld [vmem:[#allocation7 + $0xe0] sm:$0xff] }
  0x9b   : > { %529 = vmatprep.subr.bf16.mxu0 %v2238_v6  ;;  %v293_v6 = vld [vmem:[#allocation7 + $0xf0] sm:$0xff]  ;;  %v2325_v37 = vld [vmem:[%s2948_s4 + $0x2a0] ss:$8 sps:$4 sm:$0xff]  }
  0x9c   : > { %v309_v7 = vpack.c.bf16 %v293_v6, %v291_v5 }
  0x9d   : > { %880 = vmatpush1.bf16.msra.mxu1 %v2282_v40 }
  0x9e   : > { %530 = vmatpush1.bf16.msra.mxu0 %v2240_v9  ;;  %v2285_v9 = vld [vmem:[%s2948_s4 + $0x1c0] ss:$8 sps:$4 sm:$0xff]   ;;  %881 = vmatprep.subr.bf16.mxu1 %v2283_v8 }
  0x9f   : > { %531 = vmatprep.subr.bf16.mxu0 %v2241_v11  ;;  %v2288_v11 = vld [vmem:[%s2948_s4 + $0x1d0] ss:$8 sps:$4 sm:$0xff]  }
  0xa1   : > { %882 = vmatpush1.bf16.msra.mxu1 %v2285_v9 }
  0xa2   : > { %532 = vmatpush1.bf16.msra.mxu0 %v2243_v13  ;;  %883 = vmatprep.subr.bf16.mxu1 %v2286_v10  ;;  %v2291_v13 = vld [vmem:[%s2948_s4 + $0x1e0] ss:$8 sps:$4 sm:$0xff]  }
  0xa3   : > { %533 = vmatprep.subr.bf16.mxu0 %v2244_v15  ;;  %v2294_v15 = vld [vmem:[%s2948_s4 + $0x1f0] ss:$8 sps:$4 sm:$0xff]  }
  0xa5   : > { %884 = vmatpush1.bf16.msra.mxu1 %v2288_v11 }
  0xa6   : > { %534 = vmatpush1.bf16.msra.mxu0 %v2246_v17  ;;  %885 = vmatprep.subr.bf16.mxu1 %v2289_v12  ;;  %v2297_v17 = vld [vmem:[%s2948_s4 + $0x204] ss:$8 sps:$4 sm:$0xff]  }
  0xa7   : > { %1211 = vmatprep.subr.bf16.mxu0 %v2297_v17 }
  0xa9   : > { %536 = vmatmul.mubr.bf16.vlgmr.msra.gmra.mrb[0].mxu0 %v295_v25  ;;  %886 = vmatpush1.bf16.msra.mxu1 %v2291_v13  ;;  %v2307_v25 = vld [vmem:[%s2948_s4 + $0x240] ss:$8 sps:$4 sm:$0xff]  }
  0xaa   : > { %545 = vmatprep.mubr.bf16.mxu0 %v298_v27  ;;  %887 = vmatprep.subr.bf16.mxu1 %v2292_v14  ;;  %v2310_v27 = vld [vmem:[%s2948_s4 + $0x250] ss:$8 sps:$4 sm:$0xff]  }
  0xab   : > { %1212 = vmatpush1.bf16.msra.mxu0 %v2295_v16 }
  0xac   : > { %1213 = vmatprep.subr.bf16.mxu0 %v2300_v18 }
  0xad   : > { %888 = vmatpush1.bf16.msra.mxu1 %v2294_v15 }
  0xaf   : > { %1214 = vmatpush1.bf16.msra.mxu0 %v2298_v19 }
  0xb0   : > { %1215 = vmatprep.subr.bf16.mxu0 %v2303_v20 }
  0xb1   : > { %546 = vmatmul.mubr.bf16.gmra.mrb[4].mxu0 %v297_v35  ;;  %v2322_v35 = vld [vmem:[%s2948_s4 + $0x290] ss:$8 sps:$4 sm:$0xff]  }
  0xb2   : > { %555 = vmatprep.mubr.bf16.mxu0 %v300_v36  ;;  %v2327_v36 = vld [vmem:[%s2948_s4 + $0x2a4] ss:$8 sps:$4 sm:$0xff]  }
  0xb3   : > { %1216 = vmatpush1.bf16.msra.mxu0 %v2301_v21 }
  0xb4   : > { %1217 = vmatprep.subr.bf16.mxu0 %v2306_v22 }
  0xb7   : > { %1218 = vmatpush1.bf16.msra.mxu0 %v2304_v23 }
  0xb8   : > { %1219 = vmatprep.subr.bf16.mxu0 %v2309_v24 }
  0xb9   : > { %556 = vmatmul.mubr.bf16.gmra.mrb[8].mxu0 %v299_v43 }
  0xba   : > { %565 = vmatprep.mubr.bf16.mxu0 %v302_v44 }
  0xbb   : > { %1220 = vmatpush1.bf16.msra.mxu0 %v2307_v25 }
  0xbc   : > { %1221 = vmatprep.subr.bf16.mxu0 %v2312_v26 }
  0xbf   : > { %1222 = vmatpush1.bf16.msra.mxu0 %v2310_v27 }
  0xc0   : > { %1223 = vmatprep.subr.bf16.mxu0 %v2315_v28 }
  0xc1   : > { %566 = vmatmul.mubr.bf16.gmra.mrb[12].mxu0 %v301_v49 }
  0xc2   : > { %575 = vmatprep.mubr.bf16.mxu0 %v304_v50 }
  0xc3   : > { %1224 = vmatpush1.bf16.msra.mxu0 %v2313_v29 }
  0xc4   : > { %1225 = vmatprep.subr.bf16.mxu0 %v2318_v30 }
  0xc7   : > { %1226 = vmatpush1.bf16.msra.mxu0 %v2316_v31 }
  0xc8   : > { %1227 = vmatprep.subr.bf16.mxu0 %v2321_v32 }
  0xc9   : > { %576 = vmatmul.mubr.bf16.gmra.mrb[16].mxu0 %v303_v55 }
  0xca   : > { %585 = vmatprep.mubr.bf16.mxu0 %v306_v56 }
  0xcb   : > { %1228 = vmatpush1.bf16.msra.mxu0 %v2319_v33 }
  0xcc   : > { %1229 = vmatprep.subr.bf16.mxu0 %v2324_v34 }
  0xcf   : > { %1230 = vmatpush1.bf16.msra.mxu0 %v2322_v35 }
  0xd0   : > { %1231 = vmatprep.subr.bf16.mxu0 %v2327_v36 }
  0xd1   : > { %586 = vmatmul.mubr.bf16.gmra.mrb[20].mxu0 %v305_v61 }
  0xd2   : > { %595 = vmatprep.mubr.bf16.mxu0 %v308_v62 }
  0xd3   : > { %1232 = vmatpush1.bf16.msra.mxu0 %v2325_v37 }
  0xd4   : > { %1233 = vmatprep.subr.bf16.mxu0 %v2330_v38 }
  0xd7   : > { %1234 = vmatpush1.bf16.msra.mxu0 %v2328_v39 }
  0xd9   : > { %596 = vmatmul.mubr.bf16.gmra.mrb[24].mxu0 %v307_v3 }
  0xda   : > { %605 = vmatprep.mubr.bf16.mxu0 %v310_v4 }
  0xe1   : > { %606 = vmatmul.mubr.bf16.gmra.mrb[28].mxu0 %v309_v7 }
 0x17c   : > { %v537_v40 = vpop.f32.mrb[0].mxu0 }
 0x17d   : > { %2391 = vtanh.f32 %v537_v40  ;;  %v539_v41 = vpop.f32.mrb[1].mxu0 }
 0x17e   : > { %2393 = vtanh.f32 %v539_v41  ;;  %v541_v42 = vpop.f32.mrb[2].mxu0 }
 0x17f   : > { %2395 = vtanh.f32 %v541_v42  ;;  %v543_v43 = vpop.f32.mrb[3].mxu0 }
 0x180   : > { %2397 = vtanh.f32 %v543_v43 }
 0x184   : > { %v547_v44 = vpop.f32.mrb[4].mxu0 }
 0x185   : > { %2399 = vtanh.f32 %v547_v44  ;;  %v549_v45 = vpop.f32.mrb[5].mxu0 }
 0x186   : > { %2401 = vtanh.f32 %v549_v45  ;;  %v551_v46 = vpop.f32.mrb[6].mxu0 }
 0x187   : > { %v2392_v47 = vpop.eup %2391  ;;  %2403 = vtanh.f32 %v551_v46  ;;  %v553_v48 = vpop.f32.mrb[7].mxu0 }
 0x188   : > { %v2394_v49 = vpop.eup %2393  ;;  %2405 = vtanh.f32 %v553_v48 }
 0x189   : > { %v2396_v50 = vpop.eup %2395 }
 0x18a   : > { %v2398_v51 = vpop.eup %2397  ;;  %v648_v52 = vpack.c.bf16 %v2396_v50, %v2392_v47 }
 0x18b   : > { %v649_v53 = vpack.c.bf16 %v2398_v51, %v2394_v49 }
 0x18c   : > { %v557_v54 = vpop.f32.mrb[8].mxu0 }
 0x18d   : > { %2407 = vtanh.f32 %v557_v54  ;;  %v559_v55 = vpop.f32.mrb[9].mxu0  ;;  %889 = vmatprep.mubr.bf16.mxu1 %v649_v53 }
 0x18e   : > { %2409 = vtanh.f32 %v559_v55  ;;  %v561_v56 = vpop.f32.mrb[10].mxu0  ;;  %890 = vmatmul.mubr.bf16.vlgmr.msra.gmra.mrb[0].mxu1 %v648_v52 }
 0x18f   : > { %v2400_v57 = vpop.eup %2399  ;;  %2411 = vtanh.f32 %v561_v56  ;;  %v563_v58 = vpop.f32.mrb[11].mxu0  ;;  %v2333_v56 = vld [vmem:[%s2948_s4 + $0x2c4] ss:$8 sps:$4 sm:$0xff]  }
 0x190   : > { %v2402_v59 = vpop.eup %2401  ;;  %2413 = vtanh.f32 %v563_v58  ;;  %1235 = vmatprep.subr.bf16.mxu0 %v2333_v56  ;;  %v2336_v58 = vld [vmem:[%s2948_s4 + $0x2d4] ss:$8 sps:$4 sm:$0xff]  }
 0x191   : > { %v2404_v60 = vpop.eup %2403 }
 0x192   : > { %v2406_v61 = vpop.eup %2405  ;;  %v650_v62 = vpack.c.bf16 %v2404_v60, %v2400_v57  ;;  %v2331_v57 = vld [vmem:[%s2948_s4 + $0x2c0] ss:$8 sps:$4 sm:$0xff]   ;;  %v2339_v60 = vld [vmem:[%s2948_s4 + $0x2e4] ss:$8 sps:$4 sm:$0xff]  }
 0x193   : > { %v651_v63 = vpack.c.bf16 %v2406_v61, %v2402_v59  ;;  %1236 = vmatpush1.bf16.msra.mxu0 %v2331_v57  ;;  %v2334_v59 = vld [vmem:[%s2948_s4 + $0x2d0] ss:$8 sps:$4 sm:$0xff]   ;;  %v2337_v61 = vld [vmem:[%s2948_s4 + $0x2e0] ss:$8 sps:$4 sm:$0xff]  }
 0x194   : > { %v567_v0 = vpop.f32.mrb[12].mxu0  ;;  %1237 = vmatprep.subr.bf16.mxu0 %v2336_v58 }
 0x195   : > { %2415 = vtanh.f32 %v567_v0  ;;  %v569_v1 = vpop.f32.mrb[13].mxu0  ;;  %899 = vmatprep.mubr.bf16.mxu1 %v651_v63  ;;  %v2340_v63 = vld [vmem:[%s2948_s4 + $0x2f0] ss:$8 sps:$4 sm:$0xff]   ;;  %v2343_v0 = vld [vmem:[%s2948_s4 + $0x300] ss:$8 sps:$4 sm:$0xff]  }
 0x196   : > { %2417 = vtanh.f32 %v569_v1  ;;  %v571_v2 = vpop.f32.mrb[14].mxu0  ;;  %900 = vmatmul.mubr.bf16.gmra.mrb[4].mxu1 %v650_v62  ;;  %v2342_v62 = vld [vmem:[%s2948_s4 + $0x2f4] ss:$8 sps:$4 sm:$0xff]   ;;  %v2345_v1 = vld [vmem:[%s2948_s4 + $0x304] ss:$8 sps:$4 sm:$0xff]  }
 0x197   : > { %v2408_v3 = vpop.eup %2407  ;;  %2419 = vtanh.f32 %v571_v2  ;;  %v573_v4 = vpop.f32.mrb[15].mxu0  ;;  %1238 = vmatpush1.bf16.msra.mxu0 %v2334_v59  ;;  %v2348_v2 = vld [vmem:[%s2948_s4 + $0x314] ss:$8 sps:$4 sm:$0xff]   ;;  %1565 = vmatprep.subr.bf16.mxu1 %v2345_v1 }
 0x198   : > { %v2410_v5 = vpop.eup %2409  ;;  %2421 = vtanh.f32 %v573_v4  ;;  %1239 = vmatprep.subr.bf16.mxu0 %v2339_v60  ;;  %1566 = vmatpush1.bf16.msra.mxu1 %v2343_v0  ;;  %v2351_v4 = vld [vmem:[%s2948_s4 + $0x324] ss:$8 sps:$4 sm:$0xff]  }
 0x199   : > { %v2412_v6 = vpop.eup %2411  ;;  %1567 = vmatprep.subr.bf16.mxu1 %v2348_v2 }
 0x19a   : > { %v2414_v7 = vpop.eup %2413  ;;  %v652_v8 = vpack.c.bf16 %v2412_v6, %v2408_v3  ;;  %v2346_v3 = vld [vmem:[%s2948_s4 + $0x310] ss:$8 sps:$4 sm:$0xff]   ;;  %v2354_v6 = vld [vmem:[%s2948_s4 + $0x334] ss:$8 sps:$4 sm:$0xff]  }
 0x19b   : > { %v653_v9 = vpack.c.bf16 %v2414_v7, %v2410_v5  ;;  %1240 = vmatpush1.bf16.msra.mxu0 %v2337_v61  ;;  %v2349_v5 = vld [vmem:[%s2948_s4 + $0x320] ss:$8 sps:$4 sm:$0xff]   ;;  %v2352_v7 = vld [vmem:[%s2948_s4 + $0x330] ss:$8 sps:$4 sm:$0xff]  }
 0x19c   : > { %v577_v10 = vpop.f32.mrb[16].mxu0  ;;  %1241 = vmatprep.subr.bf16.mxu0 %v2342_v62  ;;  %1568 = vmatpush1.bf16.msra.mxu1 %v2346_v3 }
 0x19d   : > { %2423 = vtanh.f32 %v577_v10  ;;  %v579_v11 = vpop.f32.mrb[17].mxu0  ;;  %909 = vmatprep.mubr.bf16.mxu1 %v653_v9  ;;  %1569 = vmatprep.subr.bf16.mxu1 %v2351_v4  ;;  %v2355_v9 = vld [vmem:[%s2948_s4 + $0x340] ss:$8 sps:$4 sm:$0xff]   ;;  %v2360_v10 = vld [vmem:[%s2948_s4 + $0x354] ss:$8 sps:$4 sm:$0xff]  }
 0x19e   : > { %2425 = vtanh.f32 %v579_v11  ;;  %v581_v12 = vpop.f32.mrb[18].mxu0  ;;  %910 = vmatmul.mubr.bf16.gmra.mrb[8].mxu1 %v652_v8  ;;  %v2357_v8 = vld [vmem:[%s2948_s4 + $0x344] ss:$8 sps:$4 sm:$0xff]   ;;  %v2358_v11 = vld [vmem:[%s2948_s4 + $0x350] ss:$8 sps:$4 sm:$0xff]  }
 0x19f   : > { %v2416_v13 = vpop.eup %2415  ;;  %2427 = vtanh.f32 %v581_v12  ;;  %v583_v14 = vpop.f32.mrb[19].mxu0  ;;  %1242 = vmatpush1.bf16.msra.mxu0 %v2340_v63  ;;  %v2363_v12 = vld [vmem:[%s2948_s4 + $0x364] ss:$8 sps:$4 sm:$0xff]  }
 0x1a0   : > { %v2418_v15 = vpop.eup %2417  ;;  %2429 = vtanh.f32 %v583_v14  ;;  %1570 = vmatpush1.bf16.msra.mxu1 %v2349_v5  ;;  %v2366_v14 = vld [vmem:[%s2948_s4 + $0x374] ss:$8 sps:$4 sm:$0xff]  }
 0x1a1   : > { %v2420_v16 = vpop.eup %2419  ;;  %1571 = vmatprep.subr.bf16.mxu1 %v2354_v6 }
 0x1a2   : > { %v2422_v17 = vpop.eup %2421  ;;  %v654_v18 = vpack.c.bf16 %v2420_v16, %v2416_v13  ;;  %v2361_v13 = vld [vmem:[%s2948_s4 + $0x360] ss:$8 sps:$4 sm:$0xff]   ;;  %v2369_v16 = vld [vmem:[%s2948_s4 + $0x384] ss:$8 sps:$4 sm:$0xff]  }
 0x1a3   : > { %v655_v19 = vpack.c.bf16 %v2422_v17, %v2418_v15  ;;  %v2364_v15 = vld [vmem:[%s2948_s4 + $0x370] ss:$8 sps:$4 sm:$0xff]   ;;  %v2367_v17 = vld [vmem:[%s2948_s4 + $0x380] ss:$8 sps:$4 sm:$0xff]  }
 0x1a4   : > { %v587_v20 = vpop.f32.mrb[20].mxu0  ;;  %1572 = vmatpush1.bf16.msra.mxu1 %v2352_v7 }
 0x1a5   : > { %2431 = vtanh.f32 %v587_v20  ;;  %v589_v21 = vpop.f32.mrb[21].mxu0  ;;  %919 = vmatprep.mubr.bf16.mxu1 %v655_v19  ;;  %1573 = vmatprep.subr.bf16.mxu1 %v2357_v8  ;;  %v2370_v19 = vld [vmem:[%s2948_s4 + $0x390] ss:$8 sps:$4 sm:$0xff]   ;;  %v2375_v20 = vld [vmem:[%s2948_s4 + $0x3a4] ss:$8 sps:$4 sm:$0xff]  }
 0x1a6   : > { %2433 = vtanh.f32 %v589_v21  ;;  %v591_v22 = vpop.f32.mrb[22].mxu0  ;;  %920 = vmatmul.mubr.bf16.gmra.mrb[12].mxu1 %v654_v18  ;;  %v2372_v18 = vld [vmem:[%s2948_s4 + $0x394] ss:$8 sps:$4 sm:$0xff]   ;;  %v2373_v21 = vld [vmem:[%s2948_s4 + $0x3a0] ss:$8 sps:$4 sm:$0xff]  }
 0x1a7   : > { %v2424_v23 = vpop.eup %2423  ;;  %2435 = vtanh.f32 %v591_v22  ;;  %v593_v24 = vpop.f32.mrb[23].mxu0  ;;  %v2378_v22 = vld [vmem:[%s2948_s4 + $0x3b4] ss:$8 sps:$4 sm:$0xff]  }
 0x1a8   : > { %v2426_v25 = vpop.eup %2425  ;;  %2437 = vtanh.f32 %v593_v24  ;;  %1574 = vmatpush1.bf16.msra.mxu1 %v2355_v9 }
 0x1a9   : > { %v2428_v26 = vpop.eup %2427  ;;  %1575 = vmatprep.subr.bf16.mxu1 %v2360_v10 }
 0x1aa   : > { %v2430_v27 = vpop.eup %2429  ;;  %v656_v28 = vpack.c.bf16 %v2428_v26, %v2424_v23  ;;  %v2376_v23 = vld [vmem:[%s2948_s4 + $0x3b0] ss:$8 sps:$4 sm:$0xff]  }
 0x1ab   : > { %v657_v29 = vpack.c.bf16 %v2430_v27, %v2426_v25 }
 0x1ac   : > { %v597_v30 = vpop.f32.mrb[24].mxu0  ;;  %1576 = vmatpush1.bf16.msra.mxu1 %v2358_v11 }
 0x1ad   : > { %2439 = vtanh.f32 %v597_v30  ;;  %v599_v31 = vpop.f32.mrb[25].mxu0  ;;  %929 = vmatprep.mubr.bf16.mxu1 %v657_v29  ;;  %1577 = vmatprep.subr.bf16.mxu1 %v2363_v12 }
 0x1ae   : > { %2441 = vtanh.f32 %v599_v31  ;;  %v601_v32 = vpop.f32.mrb[26].mxu0  ;;  %930 = vmatmul.mubr.bf16.gmra.mrb[16].mxu1 %v656_v28 }
 0x1af   : > { %v2432_v33 = vpop.eup %2431  ;;  %2443 = vtanh.f32 %v601_v32  ;;  %v603_v34 = vpop.f32.mrb[27].mxu0 }
 0x1b0   : > { %v2434_v35 = vpop.eup %2433  ;;  %2445 = vtanh.f32 %v603_v34  ;;  %1578 = vmatpush1.bf16.msra.mxu1 %v2361_v13 }
 0x1b1   : > { %v2436_v36 = vpop.eup %2435  ;;  %1579 = vmatprep.subr.bf16.mxu1 %v2366_v14 }
 0x1b2   : > { %v2438_v37 = vpop.eup %2437  ;;  %v658_v38 = vpack.c.bf16 %v2436_v36, %v2432_v33 }
 0x1b3   : > { %v659_v39 = vpack.c.bf16 %v2438_v37, %v2434_v35 }
 0x1b4   : > { %v607_v40 = vpop.f32.mrb[28].mxu0  ;;  %1580 = vmatpush1.bf16.msra.mxu1 %v2364_v15 }
 0x1b5   : > { %2447 = vtanh.f32 %v607_v40  ;;  %v609_v41 = vpop.f32.mrb[29].mxu0  ;;  %939 = vmatprep.mubr.bf16.mxu1 %v659_v39  ;;  %1581 = vmatprep.subr.bf16.mxu1 %v2369_v16 }
 0x1b6   : > { %2449 = vtanh.f32 %v609_v41  ;;  %v611_v42 = vpop.f32.mrb[30].mxu0  ;;  %940 = vmatmul.mubr.bf16.gmra.mrb[20].mxu1 %v658_v38 }
 0x1b7   : > { %v2440_v43 = vpop.eup %2439  ;;  %2451 = vtanh.f32 %v611_v42  ;;  %v613_v44 = vpop.f32.mrb[31].mxu0 }
 0x1b8   : > { %v2442_v45 = vpop.eup %2441  ;;  %2453 = vtanh.f32 %v613_v44  ;;  %1582 = vmatpush1.bf16.msra.mxu1 %v2367_v17 }
 0x1b9   : > { %v2444_v46 = vpop.eup %2443  ;;  %1583 = vmatprep.subr.bf16.mxu1 %v2372_v18 }
 0x1ba   : > { %v2446_v47 = vpop.eup %2445  ;;  %v660_v48 = vpack.c.bf16 %v2444_v46, %v2440_v43 }
 0x1bb   : > { %v661_v49 = vpack.c.bf16 %v2446_v47, %v2442_v45 }
 0x1bc   : > { %1584 = vmatpush1.bf16.msra.mxu1 %v2370_v19 }
 0x1bd   : > { %949 = vmatprep.mubr.bf16.mxu1 %v661_v49  ;;  %1585 = vmatprep.subr.bf16.mxu1 %v2375_v20 }
 0x1be   : > { %950 = vmatmul.mubr.bf16.gmra.mrb[24].mxu1 %v660_v48 }
 0x1bf   : > { %v2448_v50 = vpop.eup %2447 }
 0x1c0   : > { %v2450_v51 = vpop.eup %2449  ;;  %1586 = vmatpush1.bf16.msra.mxu1 %v2373_v21 }
 0x1c1   : > { %v2452_v52 = vpop.eup %2451  ;;  %1587 = vmatprep.subr.bf16.mxu1 %v2378_v22 }
 0x1c2   : > { %v2454_v53 = vpop.eup %2453  ;;  %v662_v54 = vpack.c.bf16 %v2452_v52, %v2448_v50 }
 0x1c3   : > { %v663_v55 = vpack.c.bf16 %v2454_v53, %v2450_v51 }
 0x1c4   : > { %1588 = vmatpush1.bf16.msra.mxu1 %v2376_v23 }
 0x1c5   : > { %959 = vmatprep.mubr.bf16.mxu1 %v663_v55 }
 0x1c6   : > { %960 = vmatmul.mubr.bf16.gmra.mrb[28].mxu1 %v662_v54 }
 0x261   : > { %v891_v24 = vpop.f32.mrb[0].mxu1 }
 0x262   : > { %2455 = vtanh.f32 %v891_v24  ;;  %v893_v25 = vpop.f32.mrb[1].mxu1 }
 0x263   : > { %2457 = vtanh.f32 %v893_v25  ;;  %v895_v26 = vpop.f32.mrb[2].mxu1 }
 0x264   : > { %2459 = vtanh.f32 %v895_v26  ;;  %v897_v27 = vpop.f32.mrb[3].mxu1 }
 0x265   : > { %2461 = vtanh.f32 %v897_v27 }
 0x269   : > { %v901_v28 = vpop.f32.mrb[4].mxu1 }
 0x26a   : > { %2463 = vtanh.f32 %v901_v28  ;;  %v903_v29 = vpop.f32.mrb[5].mxu1 }
 0x26b   : > { %2465 = vtanh.f32 %v903_v29  ;;  %v905_v30 = vpop.f32.mrb[6].mxu1 }
 0x26c   : > { %v2456_v31 = vpop.eup %2455  ;;  %2467 = vtanh.f32 %v905_v30  ;;  %v907_v32 = vpop.f32.mrb[7].mxu1 }
 0x26d   : > { %v2458_v33 = vpop.eup %2457  ;;  %2469 = vtanh.f32 %v907_v32 }
 0x26e   : > { %v2460_v34 = vpop.eup %2459 }
 0x26f   : > { %v2462_v35 = vpop.eup %2461  ;;  %v1002_v36 = vpack.c.bf16 %v2460_v34, %v2456_v31 }
 0x270   : > { %v1003_v37 = vpack.c.bf16 %v2462_v35, %v2458_v33 }
 0x271   : > { %v911_v38 = vpop.f32.mrb[8].mxu1 }
 0x272   : > { %2471 = vtanh.f32 %v911_v38  ;;  %v913_v39 = vpop.f32.mrb[9].mxu1  ;;  %1243 = vmatprep.mubr.bf16.mxu0 %v1003_v37 }
 0x273   : > { %2473 = vtanh.f32 %v913_v39  ;;  %v915_v40 = vpop.f32.mrb[10].mxu1  ;;  %1244 = vmatmul.mubr.bf16.vlgmr.msra.gmra.mrb[32].mxu0 %v1002_v36 }
 0x274   : > { %v2464_v41 = vpop.eup %2463  ;;  %2475 = vtanh.f32 %v915_v40  ;;  %v917_v42 = vpop.f32.mrb[11].mxu1  ;;  %v2381_v40 = vld [vmem:[%s2948_s4 + $0x3c4] ss:$8 sps:$4 sm:$0xff]  }
 0x275   : > { %v2466_v43 = vpop.eup %2465  ;;  %2477 = vtanh.f32 %v917_v42  ;;  %1589 = vmatprep.subr.bf16.mxu1 %v2381_v40  ;;  %v2384_v42 = vld [vmem:[%s2948_s4 + $0x3d4] ss:$8 sps:$4 sm:$0xff]  }
 0x276   : > { %v2468_v44 = vpop.eup %2467 }
 0x277   : > { %v2470_v45 = vpop.eup %2469  ;;  %v1004_v46 = vpack.c.bf16 %v2468_v44, %v2464_v41  ;;  %v2379_v41 = vld [vmem:[%s2948_s4 + $0x3c0] ss:$8 sps:$4 sm:$0xff]   ;;  %v2387_v44 = vld [vmem:[%s2948_s4 + $0x3e4] ss:$8 sps:$4 sm:$0xff]  }
 0x278   : > { %v1005_v47 = vpack.c.bf16 %v2470_v45, %v2466_v43  ;;  %1590 = vmatpush1.bf16.msra.mxu1 %v2379_v41  ;;  %v2382_v43 = vld [vmem:[%s2948_s4 + $0x3d0] ss:$8 sps:$4 sm:$0xff]   ;;  %v2385_v45 = vld [vmem:[%s2948_s4 + $0x3e0] ss:$8 sps:$4 sm:$0xff]  }
 0x279   : > { %v921_v48 = vpop.f32.mrb[12].mxu1  ;;  %1591 = vmatprep.subr.bf16.mxu1 %v2384_v42 }
 0x27a   : > { %2479 = vtanh.f32 %v921_v48  ;;  %v923_v49 = vpop.f32.mrb[13].mxu1  ;;  %1253 = vmatprep.mubr.bf16.mxu0 %v1005_v47  ;;  %v2388_v47 = vld [vmem:[%s2948_s4 + $0x3f0] ss:$8 sps:$4 sm:$0xff]  }
 0x27b   : > { %2481 = vtanh.f32 %v923_v49  ;;  %v925_v50 = vpop.f32.mrb[14].mxu1  ;;  %1254 = vmatmul.mubr.bf16.gmra.mrb[36].mxu0 %v1004_v46  ;;  %v2390_v46 = vld [vmem:[%s2948_s4 + $0x3f4] ss:$8 sps:$4 sm:$0xff]  }
 0x27c   : > { %v2472_v51 = vpop.eup %2471  ;;  %2483 = vtanh.f32 %v925_v50  ;;  %v927_v52 = vpop.f32.mrb[15].mxu1  ;;  %1592 = vmatpush1.bf16.msra.mxu1 %v2382_v43 }
 0x27d   : > { %v2474_v53 = vpop.eup %2473  ;;  %2485 = vtanh.f32 %v927_v52  ;;  %1593 = vmatprep.subr.bf16.mxu1 %v2387_v44 }
 0x27e   : > { %v2476_v54 = vpop.eup %2475 }
 0x27f   : > { %v2478_v55 = vpop.eup %2477  ;;  %v1006_v56 = vpack.c.bf16 %v2476_v54, %v2472_v51 }
 0x280   : > { %v1007_v57 = vpack.c.bf16 %v2478_v55, %v2474_v53  ;;  %1594 = vmatpush1.bf16.msra.mxu1 %v2385_v45 }
 0x281   : > { %v931_v58 = vpop.f32.mrb[16].mxu1  ;;  %1595 = vmatprep.subr.bf16.mxu1 %v2390_v46 }
 0x282   : > { %2487 = vtanh.f32 %v931_v58  ;;  %v933_v59 = vpop.f32.mrb[17].mxu1  ;;  %1263 = vmatprep.mubr.bf16.mxu0 %v1007_v57 }
 0x283   : > { %2489 = vtanh.f32 %v933_v59  ;;  %v935_v60 = vpop.f32.mrb[18].mxu1  ;;  %1264 = vmatmul.mubr.bf16.gmra.mrb[40].mxu0 %v1006_v56 }
 0x284   : > { %v2480_v61 = vpop.eup %2479  ;;  %2491 = vtanh.f32 %v935_v60  ;;  %v937_v62 = vpop.f32.mrb[19].mxu1  ;;  %1596 = vmatpush1.bf16.msra.mxu1 %v2388_v47 }
 0x285   : > { %v2482_v63 = vpop.eup %2481  ;;  %2493 = vtanh.f32 %v937_v62 }
 0x286   : > { %v2484_v0 = vpop.eup %2483 }
 0x287   : > { %v2486_v1 = vpop.eup %2485  ;;  %v1008_v2 = vpack.c.bf16 %v2484_v0, %v2480_v61 }
 0x288   : > { %v1009_v3 = vpack.c.bf16 %v2486_v1, %v2482_v63 }
 0x289   : > { %v941_v4 = vpop.f32.mrb[20].mxu1 }
 0x28a   : > { %2495 = vtanh.f32 %v941_v4  ;;  %v943_v5 = vpop.f32.mrb[21].mxu1  ;;  %1273 = vmatprep.mubr.bf16.mxu0 %v1009_v3 }
 0x28b   : > { %2497 = vtanh.f32 %v943_v5  ;;  %v945_v6 = vpop.f32.mrb[22].mxu1  ;;  %1274 = vmatmul.mubr.bf16.gmra.mrb[44].mxu0 %v1008_v2 }
 0x28c   : > { %v2488_v7 = vpop.eup %2487  ;;  %2499 = vtanh.f32 %v945_v6  ;;  %v947_v8 = vpop.f32.mrb[23].mxu1 }
 0x28d   : > { %v2490_v9 = vpop.eup %2489  ;;  %2501 = vtanh.f32 %v947_v8 }
 0x28e   : > { %v2492_v10 = vpop.eup %2491 }
 0x28f   : > { %v2494_v11 = vpop.eup %2493  ;;  %v1010_v12 = vpack.c.bf16 %v2492_v10, %v2488_v7 }
 0x290   : > { %v1011_v13 = vpack.c.bf16 %v2494_v11, %v2490_v9 }
 0x291   : > { %v951_v14 = vpop.f32.mrb[24].mxu1 }
 0x292   : > { %2503 = vtanh.f32 %v951_v14  ;;  %v953_v15 = vpop.f32.mrb[25].mxu1  ;;  %1283 = vmatprep.mubr.bf16.mxu0 %v1011_v13 }
 0x293   : > { %2505 = vtanh.f32 %v953_v15  ;;  %v955_v16 = vpop.f32.mrb[26].mxu1  ;;  %1284 = vmatmul.mubr.bf16.gmra.mrb[48].mxu0 %v1010_v12 }
 0x294   : > { %v2496_v17 = vpop.eup %2495  ;;  %2507 = vtanh.f32 %v955_v16  ;;  %v957_v18 = vpop.f32.mrb[27].mxu1 }
 0x295   : > { %v2498_v19 = vpop.eup %2497  ;;  %2509 = vtanh.f32 %v957_v18 }
 0x296   : > { %v2500_v20 = vpop.eup %2499 }
 0x297   : > { %v2502_v21 = vpop.eup %2501  ;;  %v1012_v22 = vpack.c.bf16 %v2500_v20, %v2496_v17 }
 0x298   : > { %v1013_v23 = vpack.c.bf16 %v2502_v21, %v2498_v19 }
 0x299   : > { %v961_v24 = vpop.f32.mrb[28].mxu1 }
 0x29a   : > { %2511 = vtanh.f32 %v961_v24  ;;  %v963_v25 = vpop.f32.mrb[29].mxu1  ;;  %1293 = vmatprep.mubr.bf16.mxu0 %v1013_v23 }
 0x29b   : > { %2513 = vtanh.f32 %v963_v25  ;;  %v965_v26 = vpop.f32.mrb[30].mxu1  ;;  %1294 = vmatmul.mubr.bf16.gmra.mrb[52].mxu0 %v1012_v22 }
 0x29c   : > { %v2504_v27 = vpop.eup %2503  ;;  %2515 = vtanh.f32 %v965_v26  ;;  %v967_v28 = vpop.f32.mrb[31].mxu1 }
 0x29d   : > { %v2506_v29 = vpop.eup %2505  ;;  %2517 = vtanh.f32 %v967_v28 }
 0x29e   : > { %v2508_v30 = vpop.eup %2507 }
 0x29f   : > { %v2510_v31 = vpop.eup %2509  ;;  %v1014_v32 = vpack.c.bf16 %v2508_v30, %v2504_v27 }
 0x2a0   : > { %v1015_v33 = vpack.c.bf16 %v2510_v31, %v2506_v29 }
 0x2a2   : > { %1303 = vmatprep.mubr.bf16.mxu0 %v1015_v33 }
 0x2a3   : > { %1304 = vmatmul.mubr.bf16.gmra.mrb[56].mxu0 %v1014_v32 }
 0x2a4   : > { %v2512_v34 = vpop.eup %2511 }
 0x2a5   : > { %v2514_v35 = vpop.eup %2513 }
 0x2a6   : > { %v2516_v36 = vpop.eup %2515 }
 0x2a7   : > { %v2518_v37 = vpop.eup %2517  ;;  %v1016_v38 = vpack.c.bf16 %v2516_v36, %v2512_v34 }
 0x2a8   : > { %v1017_v39 = vpack.c.bf16 %v2518_v37, %v2514_v35 }
 0x2aa   : > { %1313 = vmatprep.mubr.bf16.mxu0 %v1017_v39 }
 0x2ab   : > { %1314 = vmatmul.mubr.bf16.gmra.mrb[60].mxu0 %v1016_v38 }
 0x346   : > { %v1245_v48 = vpop.f32.mrb[32].mxu0 }
 0x347   : > { %2519 = vtanh.f32 %v1245_v48  ;;  %v1247_v49 = vpop.f32.mrb[33].mxu0 }
 0x348   : > { %2521 = vtanh.f32 %v1247_v49  ;;  %v1249_v50 = vpop.f32.mrb[34].mxu0 }
 0x349   : > { %2523 = vtanh.f32 %v1249_v50  ;;  %v1251_v51 = vpop.f32.mrb[35].mxu0 }
 0x34a   : > { %2525 = vtanh.f32 %v1251_v51 }
 0x34e   : > { %v1255_v52 = vpop.f32.mrb[36].mxu0 }
 0x34f   : > { %2527 = vtanh.f32 %v1255_v52  ;;  %v1257_v53 = vpop.f32.mrb[37].mxu0 }
 0x350   : > { %2529 = vtanh.f32 %v1257_v53  ;;  %v1259_v54 = vpop.f32.mrb[38].mxu0 }
 0x351   : > { %v2520_v55 = vpop.eup %2519  ;;  %2531 = vtanh.f32 %v1259_v54  ;;  %v1261_v56 = vpop.f32.mrb[39].mxu0 }
 0x352   : > { %v2522_v57 = vpop.eup %2521  ;;  %2533 = vtanh.f32 %v1261_v56 }
 0x353   : > { %v2524_v58 = vpop.eup %2523 }
 0x354   : > { %v2526_v59 = vpop.eup %2525  ;;  %v1356_v60 = vpack.c.bf16 %v2524_v58, %v2520_v55 }
 0x355   : > { %v1357_v61 = vpack.c.bf16 %v2526_v59, %v2522_v57 }
 0x356   : > { %v1265_v62 = vpop.f32.mrb[40].mxu0 }
 0x357   : > { %2535 = vtanh.f32 %v1265_v62  ;;  %v1267_v63 = vpop.f32.mrb[41].mxu0  ;;  %1597 = vmatprep.mubr.bf16.mxu1 %v1357_v61 }
 0x358   : > { %2537 = vtanh.f32 %v1267_v63  ;;  %v1269_v0 = vpop.f32.mrb[42].mxu0  ;;  %1598 = vmatmul.mubr.bf16.vlgmr.msra.gmra.mrb[32].mxu1 %v1356_v60 }
 0x359   : > { %v2528_v1 = vpop.eup %2527  ;;  %2539 = vtanh.f32 %v1269_v0  ;;  %v1271_v2 = vpop.f32.mrb[43].mxu0 }
 0x35a   : > { %v2530_v3 = vpop.eup %2529  ;;  %2541 = vtanh.f32 %v1271_v2 }
 0x35b   : > { %v2532_v4 = vpop.eup %2531 }
 0x35c   : > { %v2534_v5 = vpop.eup %2533  ;;  %v1358_v6 = vpack.c.bf16 %v2532_v4, %v2528_v1 }
 0x35d   : > { %v1359_v7 = vpack.c.bf16 %v2534_v5, %v2530_v3 }
 0x35e   : > { %v1275_v8 = vpop.f32.mrb[44].mxu0 }
 0x35f   : > { %2543 = vtanh.f32 %v1275_v8  ;;  %v1277_v9 = vpop.f32.mrb[45].mxu0  ;;  %1607 = vmatprep.mubr.bf16.mxu1 %v1359_v7 }
 0x360   : > { %2545 = vtanh.f32 %v1277_v9  ;;  %v1279_v10 = vpop.f32.mrb[46].mxu0  ;;  %1608 = vmatmul.mubr.bf16.gmra.mrb[36].mxu1 %v1358_v6 }
 0x361   : > { %v2536_v11 = vpop.eup %2535  ;;  %2547 = vtanh.f32 %v1279_v10  ;;  %v1281_v12 = vpop.f32.mrb[47].mxu0 }
 0x362   : > { %v2538_v13 = vpop.eup %2537  ;;  %2549 = vtanh.f32 %v1281_v12 }
 0x363   : > { %v2540_v14 = vpop.eup %2539 }
 0x364   : > { %v2542_v15 = vpop.eup %2541  ;;  %v1360_v16 = vpack.c.bf16 %v2540_v14, %v2536_v11 }
 0x365   : > { %v1361_v17 = vpack.c.bf16 %v2542_v15, %v2538_v13 }
 0x366   : > { %v1285_v18 = vpop.f32.mrb[48].mxu0 }
 0x367   : > { %2551 = vtanh.f32 %v1285_v18  ;;  %v1287_v19 = vpop.f32.mrb[49].mxu0  ;;  %1617 = vmatprep.mubr.bf16.mxu1 %v1361_v17 }
 0x368   : > { %2553 = vtanh.f32 %v1287_v19  ;;  %v1289_v20 = vpop.f32.mrb[50].mxu0  ;;  %1618 = vmatmul.mubr.bf16.gmra.mrb[40].mxu1 %v1360_v16 }
 0x369   : > { %v2544_v21 = vpop.eup %2543  ;;  %2555 = vtanh.f32 %v1289_v20  ;;  %v1291_v22 = vpop.f32.mrb[51].mxu0 }
 0x36a   : > { %v2546_v23 = vpop.eup %2545  ;;  %2557 = vtanh.f32 %v1291_v22 }
 0x36b   : > { %v2548_v24 = vpop.eup %2547 }
 0x36c   : > { %v2550_v25 = vpop.eup %2549  ;;  %v1362_v26 = vpack.c.bf16 %v2548_v24, %v2544_v21 }
 0x36d   : > { %v1363_v27 = vpack.c.bf16 %v2550_v25, %v2546_v23 }
 0x36e   : > { %v1295_v28 = vpop.f32.mrb[52].mxu0 }
 0x36f   : > { %2559 = vtanh.f32 %v1295_v28  ;;  %v1297_v29 = vpop.f32.mrb[53].mxu0  ;;  %1627 = vmatprep.mubr.bf16.mxu1 %v1363_v27 }
 0x370   : > { %2561 = vtanh.f32 %v1297_v29  ;;  %v1299_v30 = vpop.f32.mrb[54].mxu0  ;;  %1628 = vmatmul.mubr.bf16.gmra.mrb[44].mxu1 %v1362_v26 }
 0x371   : > { %v2552_v31 = vpop.eup %2551  ;;  %2563 = vtanh.f32 %v1299_v30  ;;  %v1301_v32 = vpop.f32.mrb[55].mxu0 }
 0x372   : > { %v2554_v33 = vpop.eup %2553  ;;  %2565 = vtanh.f32 %v1301_v32 }
 0x373   : > { %v2556_v34 = vpop.eup %2555 }
 0x374   : > { %v2558_v35 = vpop.eup %2557  ;;  %v1364_v36 = vpack.c.bf16 %v2556_v34, %v2552_v31 }
 0x375   : > { %v1365_v37 = vpack.c.bf16 %v2558_v35, %v2554_v33 }
 0x376   : > { %v1305_v38 = vpop.f32.mrb[56].mxu0 }
 0x377   : > { %2567 = vtanh.f32 %v1305_v38  ;;  %v1307_v39 = vpop.f32.mrb[57].mxu0  ;;  %1637 = vmatprep.mubr.bf16.mxu1 %v1365_v37 }
 0x378   : > { %2569 = vtanh.f32 %v1307_v39  ;;  %v1309_v40 = vpop.f32.mrb[58].mxu0  ;;  %1638 = vmatmul.mubr.bf16.gmra.mrb[48].mxu1 %v1364_v36 }
 0x379   : > { %v2560_v41 = vpop.eup %2559  ;;  %2571 = vtanh.f32 %v1309_v40  ;;  %v1311_v42 = vpop.f32.mrb[59].mxu0 }
 0x37a   : > { %v2562_v43 = vpop.eup %2561  ;;  %2573 = vtanh.f32 %v1311_v42 }
 0x37b   : > { %v2564_v44 = vpop.eup %2563 }
 0x37c   : > { %v2566_v45 = vpop.eup %2565  ;;  %v1366_v46 = vpack.c.bf16 %v2564_v44, %v2560_v41 }
 0x37d   : > { %v1367_v47 = vpack.c.bf16 %v2566_v45, %v2562_v43 }
 0x37e   : > { %v1315_v48 = vpop.f32.mrb[60].mxu0 }
 0x37f   : > { %2575 = vtanh.f32 %v1315_v48  ;;  %v1317_v49 = vpop.f32.mrb[61].mxu0  ;;  %1647 = vmatprep.mubr.bf16.mxu1 %v1367_v47 }
 0x380   : > { %2577 = vtanh.f32 %v1317_v49  ;;  %v1319_v50 = vpop.f32.mrb[62].mxu0  ;;  %1648 = vmatmul.mubr.bf16.gmra.mrb[52].mxu1 %v1366_v46 }
 0x381   : > { %v2568_v51 = vpop.eup %2567  ;;  %2579 = vtanh.f32 %v1319_v50  ;;  %v1321_v52 = vpop.f32.mrb[63].mxu0 }
 0x382   : > { %v2570_v53 = vpop.eup %2569  ;;  %2581 = vtanh.f32 %v1321_v52 }
 0x383   : > { %v2572_v54 = vpop.eup %2571 }
 0x384   : > { %v2574_v55 = vpop.eup %2573  ;;  %v1368_v56 = vpack.c.bf16 %v2572_v54, %v2568_v51 }
 0x385   : > { %v1369_v57 = vpack.c.bf16 %v2574_v55, %v2570_v53 }
 0x387   : > { %1657 = vmatprep.mubr.bf16.mxu1 %v1369_v57 }
 0x388   : > { %1658 = vmatmul.mubr.bf16.gmra.mrb[56].mxu1 %v1368_v56 }
 0x389   : > { %v2576_v58 = vpop.eup %2575 }
 0x38a   : > { %v2578_v59 = vpop.eup %2577 }
 0x38b   : > { %v2580_v60 = vpop.eup %2579 }
 0x38c   : > { %v2582_v61 = vpop.eup %2581  ;;  %v1370_v62 = vpack.c.bf16 %v2580_v60, %v2576_v58 }
 0x38d   : > { %v1371_v63 = vpack.c.bf16 %v2582_v61, %v2578_v59 }
 0x38f   : > { %1667 = vmatprep.mubr.bf16.mxu1 %v1371_v63 }
 0x390   : > { %1668 = vmatmul.mubr.bf16.gmra.mrb[60].mxu1 %v1370_v62 }
 0x42b   : > { %v1599_v0 = vpop.f32.mrb[32].mxu1 }
 0x42c   : > { %2583 = vtanh.f32 %v1599_v0  ;;  %v1601_v1 = vpop.f32.mrb[33].mxu1 }
 0x42d   : > { %2585 = vtanh.f32 %v1601_v1  ;;  %v1603_v2 = vpop.f32.mrb[34].mxu1 }
 0x42e   : > { %2587 = vtanh.f32 %v1603_v2  ;;  %v1605_v3 = vpop.f32.mrb[35].mxu1 }
 0x42f   : > { %2589 = vtanh.f32 %v1605_v3 }
 0x433   : > { %v1609_v4 = vpop.f32.mrb[36].mxu1 }
 0x434   : > { %2591 = vtanh.f32 %v1609_v4  ;;  %v1611_v5 = vpop.f32.mrb[37].mxu1 }
 0x435   : > { %2593 = vtanh.f32 %v1611_v5  ;;  %v1613_v6 = vpop.f32.mrb[38].mxu1 }
 0x436   : > { %v2584_v7 = vpop.eup %2583  ;;  %2595 = vtanh.f32 %v1613_v6  ;;  %v1615_v8 = vpop.f32.mrb[39].mxu1 }
 0x437   : > { %v2586_v9 = vpop.eup %2585  ;;  %2597 = vtanh.f32 %v1615_v8 }
 0x438   : > { %v2588_v10 = vpop.eup %2587 }
 0x439   : > { %v2590_v11 = vpop.eup %2589  ;;  %v1710_v12 = vpack.c.bf16 %v2588_v10, %v2584_v7 }
 0x43a   : > { %v1711_v13 = vpack.c.bf16 %v2590_v11, %v2586_v9 }
 0x43b   : > { %v1726_v14 = vunpack.c.l.bf16 %v1710_v12  ;;  %v1728_v15 = vunpack.c.h.bf16 %v1710_v12  ;;  %v1619_v16 = vpop.f32.mrb[40].mxu1 }
 0x43c   : > { %v1727_v17 = vunpack.c.l.bf16 %v1711_v13  ;;  %v1729_v18 = vunpack.c.h.bf16 %v1711_v13  ;;  %2599 = vtanh.f32 %v1619_v16  ;;  %v1621_v19 = vpop.f32.mrb[41].mxu1 }
 0x43d   : > { %1758 = vst [vmem:[#allocation7] sm:$0xff] %v1726_v14  ;;  %1760 = vst [vmem:[#allocation7 + $0x10] sm:$0xff] %v1728_v15  ;;  %2601 = vtanh.f32 %v1621_v19  ;;  %v1623_v20 = vpop.f32.mrb[42].mxu1 }
 0x43e   : > { %v2592_v21 = vpop.eup %2591  ;;  %1759 = vst [vmem:[#allocation7 + $0x8] sm:$0xff] %v1727_v17  ;;  %1761 = vst [vmem:[#allocation7 + $0x18] sm:$0xff] %v1729_v18  ;;  %2603 = vtanh.f32 %v1623_v20  ;;  %v1625_v22 = vpop.f32.mrb[43].mxu1 }
 0x43f   : > { %v2594_v23 = vpop.eup %2593  ;;  %2605 = vtanh.f32 %v1625_v22 }
 0x440   : > { %v2596_v24 = vpop.eup %2595 }
 0x441   : > { %v2598_v25 = vpop.eup %2597  ;;  %v1712_v26 = vpack.c.bf16 %v2596_v24, %v2592_v21 }
 0x442   : > { %v1713_v27 = vpack.c.bf16 %v2598_v25, %v2594_v23 }
 0x443   : > { %v1730_v28 = vunpack.c.l.bf16 %v1712_v26  ;;  %v1732_v29 = vunpack.c.h.bf16 %v1712_v26  ;;  %v1629_v30 = vpop.f32.mrb[44].mxu1 }
 0x444   : > { %v1731_v31 = vunpack.c.l.bf16 %v1713_v27  ;;  %v1733_v32 = vunpack.c.h.bf16 %v1713_v27  ;;  %2607 = vtanh.f32 %v1629_v30  ;;  %v1631_v33 = vpop.f32.mrb[45].mxu1 }
 0x445   : > { %1762 = vst [vmem:[#allocation7 + $0x20] sm:$0xff] %v1730_v28  ;;  %1764 = vst [vmem:[#allocation7 + $0x30] sm:$0xff] %v1732_v29  ;;  %2609 = vtanh.f32 %v1631_v33  ;;  %v1633_v34 = vpop.f32.mrb[46].mxu1 }
 0x446   : > { %v2600_v35 = vpop.eup %2599  ;;  %1763 = vst [vmem:[#allocation7 + $0x28] sm:$0xff] %v1731_v31  ;;  %1765 = vst [vmem:[#allocation7 + $0x38] sm:$0xff] %v1733_v32  ;;  %2611 = vtanh.f32 %v1633_v34  ;;  %v1635_v36 = vpop.f32.mrb[47].mxu1 }
 0x447   : > { %v2602_v37 = vpop.eup %2601  ;;  %2613 = vtanh.f32 %v1635_v36 }
 0x448   : > { %v2604_v38 = vpop.eup %2603 }
 0x449   : > { %v2606_v39 = vpop.eup %2605  ;;  %v1714_v40 = vpack.c.bf16 %v2604_v38, %v2600_v35 }
 0x44a   : > { %v1715_v41 = vpack.c.bf16 %v2606_v39, %v2602_v37 }
 0x44b   : > { %v1734_v42 = vunpack.c.l.bf16 %v1714_v40  ;;  %v1736_v43 = vunpack.c.h.bf16 %v1714_v40  ;;  %v1639_v44 = vpop.f32.mrb[48].mxu1 }
 0x44c   : > { %v1735_v45 = vunpack.c.l.bf16 %v1715_v41  ;;  %v1737_v46 = vunpack.c.h.bf16 %v1715_v41  ;;  %2615 = vtanh.f32 %v1639_v44  ;;  %v1641_v47 = vpop.f32.mrb[49].mxu1 }
 0x44d   : > { %1766 = vst [vmem:[#allocation7 + $0x40] sm:$0xff] %v1734_v42  ;;  %1768 = vst [vmem:[#allocation7 + $0x50] sm:$0xff] %v1736_v43  ;;  %2617 = vtanh.f32 %v1641_v47  ;;  %v1643_v48 = vpop.f32.mrb[50].mxu1 }
 0x44e   : > { %v2608_v49 = vpop.eup %2607  ;;  %1767 = vst [vmem:[#allocation7 + $0x48] sm:$0xff] %v1735_v45  ;;  %1769 = vst [vmem:[#allocation7 + $0x58] sm:$0xff] %v1737_v46  ;;  %2619 = vtanh.f32 %v1643_v48  ;;  %v1645_v50 = vpop.f32.mrb[51].mxu1 }
 0x44f   : > { %v2610_v51 = vpop.eup %2609  ;;  %2621 = vtanh.f32 %v1645_v50 }
 0x450   : > { %v2612_v52 = vpop.eup %2611 }
 0x451   : > { %v2614_v53 = vpop.eup %2613  ;;  %v1716_v54 = vpack.c.bf16 %v2612_v52, %v2608_v49 }
 0x452   : > { %v1717_v55 = vpack.c.bf16 %v2614_v53, %v2610_v51 }
 0x453   : > { %v1738_v56 = vunpack.c.l.bf16 %v1716_v54  ;;  %v1740_v57 = vunpack.c.h.bf16 %v1716_v54  ;;  %v1649_v58 = vpop.f32.mrb[52].mxu1 }
 0x454   : > { %v1739_v59 = vunpack.c.l.bf16 %v1717_v55  ;;  %v1741_v60 = vunpack.c.h.bf16 %v1717_v55  ;;  %2623 = vtanh.f32 %v1649_v58  ;;  %v1651_v61 = vpop.f32.mrb[53].mxu1 }
 0x455   : > { %1770 = vst [vmem:[#allocation7 + $0x60] sm:$0xff] %v1738_v56  ;;  %1772 = vst [vmem:[#allocation7 + $0x70] sm:$0xff] %v1740_v57  ;;  %2625 = vtanh.f32 %v1651_v61  ;;  %v1653_v62 = vpop.f32.mrb[54].mxu1 }
 0x456   : > { %v2616_v63 = vpop.eup %2615  ;;  %1771 = vst [vmem:[#allocation7 + $0x68] sm:$0xff] %v1739_v59  ;;  %1773 = vst [vmem:[#allocation7 + $0x78] sm:$0xff] %v1741_v60  ;;  %2627 = vtanh.f32 %v1653_v62  ;;  %v1655_v0 = vpop.f32.mrb[55].mxu1 }
 0x457   : > { %v2618_v1 = vpop.eup %2617  ;;  %2629 = vtanh.f32 %v1655_v0 }
 0x458   : > { %v2620_v2 = vpop.eup %2619 }
 0x459   : > { %v2622_v3 = vpop.eup %2621  ;;  %v1718_v4 = vpack.c.bf16 %v2620_v2, %v2616_v63 }
 0x45a   : > { %v1719_v5 = vpack.c.bf16 %v2622_v3, %v2618_v1 }
 0x45b   : > { %v1742_v6 = vunpack.c.l.bf16 %v1718_v4  ;;  %v1744_v7 = vunpack.c.h.bf16 %v1718_v4  ;;  %v1659_v8 = vpop.f32.mrb[56].mxu1 }
 0x45c   : > { %v1743_v9 = vunpack.c.l.bf16 %v1719_v5  ;;  %v1745_v10 = vunpack.c.h.bf16 %v1719_v5  ;;  %2631 = vtanh.f32 %v1659_v8  ;;  %v1661_v11 = vpop.f32.mrb[57].mxu1 }
 0x45d   : > { %1774 = vst [vmem:[#allocation7 + $0x80] sm:$0xff] %v1742_v6  ;;  %1776 = vst [vmem:[#allocation7 + $0x90] sm:$0xff] %v1744_v7  ;;  %2633 = vtanh.f32 %v1661_v11  ;;  %v1663_v12 = vpop.f32.mrb[58].mxu1 }
 0x45e   : > { %v2624_v13 = vpop.eup %2623  ;;  %1775 = vst [vmem:[#allocation7 + $0x88] sm:$0xff] %v1743_v9  ;;  %1777 = vst [vmem:[#allocation7 + $0x98] sm:$0xff] %v1745_v10  ;;  %2635 = vtanh.f32 %v1663_v12  ;;  %v1665_v14 = vpop.f32.mrb[59].mxu1 }
 0x45f   : > { %v2626_v15 = vpop.eup %2625  ;;  %2637 = vtanh.f32 %v1665_v14 }
 0x460   : > { %v2628_v16 = vpop.eup %2627 }
 0x461   : > { %v2630_v17 = vpop.eup %2629  ;;  %v1720_v18 = vpack.c.bf16 %v2628_v16, %v2624_v13 }
 0x462   : > { %v1721_v19 = vpack.c.bf16 %v2630_v17, %v2626_v15 }
 0x463   : > { %v1746_v20 = vunpack.c.l.bf16 %v1720_v18  ;;  %v1748_v21 = vunpack.c.h.bf16 %v1720_v18  ;;  %v1669_v22 = vpop.f32.mrb[60].mxu1 }
 0x464   : > { %v1747_v23 = vunpack.c.l.bf16 %v1721_v19  ;;  %v1749_v24 = vunpack.c.h.bf16 %v1721_v19  ;;  %2639 = vtanh.f32 %v1669_v22  ;;  %v1671_v25 = vpop.f32.mrb[61].mxu1 }
 0x465   : > { %1778 = vst [vmem:[#allocation7 + $0xa0] sm:$0xff] %v1746_v20  ;;  %1780 = vst [vmem:[#allocation7 + $0xb0] sm:$0xff] %v1748_v21  ;;  %2641 = vtanh.f32 %v1671_v25  ;;  %v1673_v26 = vpop.f32.mrb[62].mxu1 }
 0x466   : > { %v2632_v27 = vpop.eup %2631  ;;  %1779 = vst [vmem:[#allocation7 + $0xa8] sm:$0xff] %v1747_v23  ;;  %1781 = vst [vmem:[#allocation7 + $0xb8] sm:$0xff] %v1749_v24  ;;  %2643 = vtanh.f32 %v1673_v26  ;;  %v1675_v28 = vpop.f32.mrb[63].mxu1 }
 0x467   : > { %v2634_v29 = vpop.eup %2633  ;;  %2645 = vtanh.f32 %v1675_v28 }
 0x468   : > { %v2636_v30 = vpop.eup %2635 }
 0x469   : > { %v2638_v31 = vpop.eup %2637  ;;  %v1722_v32 = vpack.c.bf16 %v2636_v30, %v2632_v27 }
 0x46a   : > { %v1723_v33 = vpack.c.bf16 %v2638_v31, %v2634_v29 }
 0x46b   : > { %v1750_v34 = vunpack.c.l.bf16 %v1722_v32  ;;  %v1752_v35 = vunpack.c.h.bf16 %v1722_v32 }
 0x46c   : > { %v1751_v36 = vunpack.c.l.bf16 %v1723_v33  ;;  %v1753_v37 = vunpack.c.h.bf16 %v1723_v33 }
 0x46d   : > { %1782 = vst [vmem:[#allocation7 + $0xc0] sm:$0xff] %v1750_v34  ;;  %1784 = vst [vmem:[#allocation7 + $0xd0] sm:$0xff] %v1752_v35 }
 0x46e   : > { %v2640_v38 = vpop.eup %2639  ;;  %1783 = vst [vmem:[#allocation7 + $0xc8] sm:$0xff] %v1751_v36  ;;  %1785 = vst [vmem:[#allocation7 + $0xd8] sm:$0xff] %v1753_v37 }
 0x46f   : > { %v2642_v39 = vpop.eup %2641 }
 0x470   : > { %v2644_v40 = vpop.eup %2643 }
 0x471   : > { %v2646_v41 = vpop.eup %2645  ;;  %v1724_v42 = vpack.c.bf16 %v2644_v40, %v2640_v38 }
 0x472   : > { %v1725_v43 = vpack.c.bf16 %v2646_v41, %v2642_v39 }
 0x473   : > { %v1754_v44 = vunpack.c.l.bf16 %v1724_v42  ;;  %v1756_v45 = vunpack.c.h.bf16 %v1724_v42 }
 0x474   : > { %v1755_v46 = vunpack.c.l.bf16 %v1725_v43  ;;  %v1757_v47 = vunpack.c.h.bf16 %v1725_v43 }
 0x475   : > { %1786 = vst [vmem:[#allocation7 + $0xe0] sm:$0xff] %v1754_v44  ;;  %1788 = vst [vmem:[#allocation7 + $0xf0] sm:$0xff] %v1756_v45 }
 0x476   : > { %1787 = vst [vmem:[#allocation7 + $0xe8] sm:$0xff] %v1755_v46  ;;  %1789 = vst [vmem:[#allocation7 + $0xf8] sm:$0xff] %v1757_v47 }
 0x477   : > { %2718 = shalt.err (!%p2715_p13)
}
 0x478   : > { %s2719_s27 = scalar_lea.hbm %s3131_s2, 4096 }
 0x479   : > { %p2720_p2 = scmp.ne.s32.totalorder %s3131_s2, %s2719_s27  ;;  %p2725_p0 = scmp.lt.u32.totalorder %s2719_s27, %s3131_s2 }
 0x47b   : > { %p2721_p3 = pnand %p2720_p2, %p3085_p4 }
 0x47d   : > { %p2722_p12 = pneg %p2721_p3 }
 0x47f   : > { %p2727_p6 = pnand %p2725_p0, %p2722_p12 }
 0x481   : > { %2730 = shalt.err (!%p2727_p6)
}
 0x482   : > { %s2798_s7 = smov 256   ;;  %s2799_s8 = smov 16  }
 0x483   : > { %2127 = dma.vmem_to_hbm [thread:$0]  (%p3085_p4), %s1801_s16, 4096, %s3131_s2, [#allocation4], %s2798_s7, %s2798_s7, %s2799_s8  }
 0x484   : > { %2764 = dma.done.wait (%p3085_p4), [#allocation4], 4096  }
 0x485   : > { %2766 = vsyncadd (%p3085_p4), [#allocation4], 4294963200 }
 0x486 PF: > { %s17_s14 = sadd.s32 1, %s2789_s14   ;;  %s3145_s9 = smov %s2773_s10 }
 0x487   : > { %p14_p7 = scmp.ge.s32.totalorder %s17_s14, 6   ;;  %s3146_s10 = smov %s2777_s11 }
 0x488   : > { %s3147_s11 = smov %s2900_s24  ;;  %s3148_s12 = smov %s2785_s13 }
 0x489   : > { %s3149_s13 = smov %s3151_s22  ;;  %16 = sbr.rel (!%p14_p7) target bundleno = 6 (0x6), region = 79 }
 0x490   :  { %1816 = vsyncpa [#allocation3], 1 }
 0x491   :  { %1818 = vsyncpa [#allocation3 + $0x1], 1 }
 0x492   :  { %1819 = vsyncpa [#allocation6], 1 }
 0x493   :  { %1821 = vsyncpa [#allocation6 + $0x1], 1 }
 0x494   :  { %1822 = vsyncpa [#allocation4], 1 }
 0x495   :  { %1824 = vsyncpa [#allocation4 + $0x1], 1 }

</bundles_post_ra>
